<compile_context>
chip_gen: v5e
topology: v5e:2x2
jax: 0.10.0
libtpu: 0.0.40
codegen_flags: <defaults>
</compile_context>

<pallas_src>
import jax
import jax.numpy as jnp
import numpy as np
from jax.experimental import pallas as pl
from jax.experimental.pallas import tpu as pltpu

# ----------------------------- problem sizes -----------------------------
B = 8          # batch
T = 8          # decode length (teacher forcing -> input_var.shape[1])
E = 32         # embed_size
H = 32         # hidden_size
Z = 16         # config.latent_size
S = 8          # encoder sequence length
V = 64         # input_size == output_size (vocab)
VP = 128       # vocab padded to a full 128-lane vreg (lane-dense stores)
ENC = 2 * H    # encoder output feature dim (bidirectional encoder)
SOS = 1        # word2idx['<SOS>']

# packed weight slab row offsets (sublane-tile aligned sections)
_O_WIH = 0                      # (E,     4H)  W_ih^T
_O_WHH = _O_WIH + E             # (H,     4H)  W_hh^T (fused, gate order i,f,g,o)
_O_BIAS = _O_WHH + H            # (8,     VP)  row 0 = b_ih+b_hh, row 1 = b_out
_O_WHC = _O_BIAS + 8            # (H+ENC, VP)  fused out-projection for [h, ctx]
_O_WOZ = _O_WHC + H + ENC       # (Z,     VP)  out-projection slice for latent
_W_ALL_ROWS = _O_WOZ + Z        # = 184 (multiple of 8)


# ------------------------------ Pallas kernel -----------------------------
def decoder_kernel(x_ref, hc0_ref, lat_ref, enc_ref, bdmask_ref, wattn_ref,
                   wall_ref, logits_ref):
    # ---- unpack the packed weight slab (static, sublane-aligned slices) ----
    w_ihT = wall_ref[_O_WIH:_O_WIH + E, :]             # (E, 4H)
    w_hhT = wall_ref[_O_WHH:_O_WHH + H, :]             # (H, 4H)
    bias_tile = wall_ref[_O_BIAS:_O_BIAS + 8, :]       # (8, VP)
    w_hc = wall_ref[_O_WHC:_O_WHC + H + ENC, :]        # (H+ENC, VP)
    w_ozT = wall_ref[_O_WOZ:_O_WOZ + Z, :]             # (Z, VP)
    b_gates = bias_tile[0:1, :]                        # (1, 4H) = b_ih + b_hh
    b_out = bias_tile[1:2, :]                          # (1, VP)

    # ---- phase 0: hoisted, time-invariant matmuls ----
    gates_x = (jnp.dot(x_ref[...], w_ihT, preferred_element_type=jnp.float32)
               + b_gates)                              # (T*B, 4H), rows t*B+b
    lat_out = (jnp.dot(lat_ref[...], w_ozT, preferred_element_type=jnp.float32)
               + b_out)                                # (B, VP) latent + bias part

    # lane mask selecting the `g` gate block [2H, 3H) of the fused pre-activation
    lane = jax.lax.broadcasted_iota(jnp.int32, (B, 4 * H), 1)
    g_lanes = (lane >= 2 * H) & (lane < 3 * H)

    # ---- phase 1: serial LSTM recurrence (only the truly recurrent work) ----
    h = hc0_ref[0]                                     # (B, H)
    c = hc0_ref[1]                                     # (B, H)
    hs = []                                            # register-resident hiddens
    for t in range(T):                                 # static unroll, T small
        # ONE fused recurrent matmul + the hoisted per-step input block (sublane
        # aligned row slice, no lane slicing before the activations).
        pre = gates_x[t * B:(t + 1) * B, :] + jnp.dot(
            h, w_hhT, preferred_element_type=jnp.float32)          # (B, 4H)
        # full-vreg activations: sigmoid via tanh identity, tanh for the g gate
        sig = 0.5 * (jnp.tanh(0.5 * pre) + 1.0)
        act = jnp.where(g_lanes, jnp.tanh(pre), sig)
        i_g = act[:, 0 * H:1 * H]
        f_g = act[:, 1 * H:2 * H]
        g_g = act[:, 2 * H:3 * H]
        o_g = act[:, 3 * H:4 * H]
        c = f_g * c + i_g * g_g
        h = o_g * jnp.tanh(c)
        hs.append(h)

    # ---- phase 2: attention + output projection, batched over all T*B rows ----
    h_tb = jnp.concatenate(hs, axis=0)                 # (T*B, H), time-major rows
    enc = enc_ref[...]                                 # (B*S, ENC), rows b*S+s

    # Luong "general" scores against every (b', s) encoder row via one 2-D
    # q @ enc^T dot; the block-diagonal additive mask (built in the wrapper) kills
    # the b' != b entries and applies the encoder padding mask.
    q = jnp.dot(h_tb, wattn_ref[...], preferred_element_type=jnp.float32)  # (T*B, ENC)
    scores = jax.lax.dot_general(q, enc, (((1,), (1,)), ((), ())),
                                 preferred_element_type=jnp.float32)       # (T*B, B*S)
    scores = scores.reshape(T, B, B * S) + bdmask_ref[...][None, :, :]
    scores = scores - jnp.max(scores, axis=-1, keepdims=True)
    p = jnp.exp(scores)                                 # masked entries -> exactly 0
    attn = p * pl.reciprocal(jnp.sum(p, axis=-1, keepdims=True), approx=True)
    ctx = jnp.dot(attn.reshape(T * B, B * S), enc,
                  preferred_element_type=jnp.float32)   # (T*B, ENC)

    # fused output projection over [h, ctx] (K = H+ENC = 96); latent part on top
    hc = jnp.concatenate([h_tb, ctx], axis=1)           # (T*B, H+ENC)
    logits = jnp.dot(hc, w_hc, preferred_element_type=jnp.float32)          # (T*B, VP)
    logits_ref[...] = logits.reshape(T, B, VP) + lat_out[None, :, :]


def _full_spec(shape):
    nd = len(shape)
    return pl.BlockSpec(shape, lambda i, _nd=nd: (0,) * _nd)


def decoder_forward(input_var, init_state, latent_var, enc_output, enc_mask, params):
    """Teacher-forcing forward.  Returns dict mirroring the PyTorch module."""
    h0, c0 = init_state                         # each (L=1, B, H)
    hc0 = jnp.stack([h0[0], c0[0]], axis=0)     # (2, B, H)
    Bz, Tz = input_var.shape

    # glue: token shift (<SOS> then teacher tokens) + embedding gather, time-major
    go = jnp.full((Bz, 1), SOS, dtype=input_var.dtype)
    tokens = jnp.concatenate([go, input_var[:, :-1]], axis=1)        # (B, T)
    x_emb = params["embed"][tokens]                                  # (B, T, E)
    x_flat = jnp.transpose(x_emb, (1, 0, 2)).reshape(Tz * Bz, E)     # rows t*B+b

    # ---- packed weight slab (all 128-lane wide) -> one operand / one DMA ----
    w_ihT = params["w_ih"].T                                         # (E, 4H)
    w_hhT = params["w_hh"].T                                         # (H, 4H)
    b_gates = (params["b_ih"] + params["b_hh"]).reshape(1, 4 * H)

    w_out = params["w_out"]                                          # (V, 3H+Z)
    padV = ((0, 0), (0, VP - V))
    w_ohT = jnp.pad(w_out[:, :H].T, padV)                            # (H, VP)
    w_ocT = jnp.pad(w_out[:, H:H + ENC].T, padV)                     # (ENC, VP)
    w_ozT = jnp.pad(w_out[:, H + ENC:].T, padV)                      # (Z, VP)
    b_out = jnp.pad(params["b_out"], (0, VP - V)).reshape(1, VP)
    bias_tile = jnp.concatenate(
        [b_gates, b_out, jnp.zeros((6, VP), jnp.float32)], axis=0)   # (8, VP)
    w_all = jnp.concatenate(
        [w_ihT, w_hhT, bias_tile, w_ohT, w_ocT, w_ozT], axis=0)      # (184, VP)
    assert w_all.shape == (_W_ALL_ROWS, VP)

    # encoder flattened to (B*S, ENC) + block-diagonal additive attention mask:
    #   bd[b, b'*S + s] = (0 if enc_mask[b,s] else -1e9) if b'==b else -1e9
    enc_flat = enc_output.reshape(Bz * S, ENC)
    badd = jnp.where(enc_mask > 0, 0.0, -1e9).astype(jnp.float32)    # (B, S)
    eye = jnp.eye(Bz, dtype=jnp.float32)
    bd_mask = jnp.where(eye[:, :, None] > 0, badd[:, None, :],
                        jnp.float32(-1e9)).reshape(Bz, Bz * S)       # (B, B*S)

    out_tb = pl.pallas_call(
        decoder_kernel,
        out_shape=jax.ShapeDtypeStruct((Tz, Bz, VP), jnp.float32),
        grid_spec=pltpu.PrefetchScalarGridSpec(
            num_scalar_prefetch=0,
            grid=(1,),                          # single invocation
            in_specs=[
                _full_spec((Tz * Bz, E)),       # x, time-major flattened
                _full_spec((2, Bz, H)),         # [h0; c0]
                _full_spec((Bz, Z)),            # latent
                _full_spec((Bz * S, ENC)),      # encoder outputs, flattened
                _full_spec((Bz, Bz * S)),       # block-diag additive attention mask
                _full_spec((H, ENC)),           # W_attn
                _full_spec((_W_ALL_ROWS, VP)),  # packed weight slab
            ],
            out_specs=_full_spec((Tz, Bz, VP)),
        ),
        compiler_params=pltpu.CompilerParams(
            dimension_semantics=("arbitrary",),
        ),
    )(x_flat, hc0, latent_var, enc_flat, bd_mask, params["w_attn"], w_all)

    logits = jnp.transpose(out_tb, (1, 0, 2))[:, :, :V]   # (B, T, V): drop pad
    return {
        "logits": logits,
        "logprobs": jnp.zeros((Bz, Tz), jnp.float32),
        "sample_wordIdx": None,
        "decode": None,
        "decode_len": None,
        "hiddens": None,
        "mode": "teacher_force",
    }


# ----------------------- pure-JAX reference (for check) --------------------
def reference_forward(input_var, init_state, latent_var, enc_output, enc_mask, params):
    h0, c0 = init_state[0][0], init_state[1][0]
    go = jnp.full((input_var.shape[0], 1), SOS, dtype=input_var.dtype)
    tokens = jnp.concatenate([go, input_var[:, :-1]], axis=1)
    x_emb = params["embed"][tokens]                       # (B, T, E)
    b_comb = params["b_ih"] + params["b_hh"]
    w_out, b_out = params["w_out"], params["b_out"]

    def step(carry, x):
        h, c = carry
        gates = x @ params["w_ih"].T + h @ params["w_hh"].T + b_comb
        i_g = jax.nn.sigmoid(gates[:, :H])
        f_g = jax.nn.sigmoid(gates[:, H:2 * H])
        g_g = jnp.tanh(gates[:, 2 * H:3 * H])
        o_g = jax.nn.sigmoid(gates[:, 3 * H:])
        c_n = f_g * c + i_g * g_g
        h_n = o_g * jnp.tanh(c_n)
        q = h_n @ params["w_attn"]
        sc = jnp.einsum("be,bse->bs", q, enc_output)
        sc = jnp.where(enc_mask > 0, sc, -1e9)
        a = jax.nn.softmax(sc, axis=-1)
        ctx = jnp.einsum("bs,bse->be", a, enc_output)
        feat = jnp.concatenate([h_n, ctx, latent_var], axis=1)
        return (h_n, c_n), feat @ w_out.T + b_out

    (_, _), logits_tm = jax.lax.scan(step, (h0, c0), jnp.transpose(x_emb, (1, 0, 2)))
    return jnp.transpose(logits_tm, (1, 0, 2))


# --------------------------------- main ------------------------------------
if __name__ == "__main__":
    key = jax.random.PRNGKey(0)
    ks = jax.random.split(key, 12)

    params = {
        "embed":  jax.random.normal(ks[0], (V, E), jnp.float32) * 0.1,
        "w_ih":   jax.random.normal(ks[1], (4 * H, E), jnp.float32) * 0.1,
        "w_hh":   jax.random.normal(ks[2], (4 * H, H), jnp.float32) * 0.1,
        "b_ih":   jax.random.normal(ks[3], (4 * H,), jnp.float32) * 0.1,
        "b_hh":   jax.random.normal(ks[4], (4 * H,), jnp.float32) * 0.1,
        "w_attn": jax.random.normal(ks[5], (H, ENC), jnp.float32) * 0.1,
        "w_out":  jax.random.normal(ks[6], (V, 3 * H + Z), jnp.float32) * 0.1,
        "b_out":  jax.random.normal(ks[7], (V,), jnp.float32) * 0.1,
    }

    input_var = jax.random.randint(ks[8], (B, T), 0, V, dtype=jnp.int32)
    h0 = jax.random.normal(ks[9], (1, B, H), jnp.float32) * 0.1
    c0 = jax.random.normal(ks[10], (1, B, H), jnp.float32) * 0.1
    latent_var = jax.random.normal(ks[11], (B, Z), jnp.float32) * 0.1
    enc_output = jax.random.normal(jax.random.PRNGKey(42), (B, S, ENC), jnp.float32) * 0.1
    lens = jax.random.randint(jax.random.PRNGKey(7), (B,), 3, S + 1)
    enc_mask = (jnp.arange(S)[None, :] < lens[:, None]).astype(jnp.float32)

    out = decoder_forward(input_var, (h0, c0), latent_var, enc_output, enc_mask, params)
    logits = jax.block_until_ready(out["logits"])

    ref = reference_forward(input_var, (h0, c0), latent_var, enc_output, enc_mask, params)
    np.testing.assert_allclose(np.asarray(logits), np.asarray(ref), rtol=1e-2, atol=1e-2)

    assert logits.shape == (B, T, V)
    assert out["logprobs"].shape == (B, T)
    print("KERNEL_OK")
</pallas_src>

<mosaic_0001>
module attributes {stable_mosaic.version = 11 : i64} {
  func.func @decoder_kernel(%arg0: i32, %arg1: memref<64x32xf32, #tpu.memory_space<vmem>>, %arg2: memref<2x8x32xf32, #tpu.memory_space<vmem>>, %arg3: memref<8x16xf32, #tpu.memory_space<vmem>>, %arg4: memref<64x64xf32, #tpu.memory_space<vmem>>, %arg5: memref<8x64xf32, #tpu.memory_space<vmem>>, %arg6: memref<32x64xf32, #tpu.memory_space<vmem>>, %arg7: memref<184x128xf32, #tpu.memory_space<vmem>>, %arg8: memref<8x8x128xf32, #tpu.memory_space<vmem>>) attributes {dimension_semantics = [#tpu.dimension_semantics<arbitrary>], iteration_bounds = array<i64: 1>, scalar_prefetch = 0 : i64, scratch_operands = 0 : i64, tpu.core_type = #tpu.core_type<tc>, window_params = [{pipeline_mode = #tpu.pipeline_mode<synchronous>, transform_indices = @transform_0, window_bounds = array<i64: 64, 32>}, {pipeline_mode = #tpu.pipeline_mode<synchronous>, transform_indices = @transform_1, window_bounds = array<i64: 2, 8, 32>}, {pipeline_mode = #tpu.pipeline_mode<synchronous>, transform_indices = @transform_2, window_bounds = array<i64: 8, 16>}, {pipeline_mode = #tpu.pipeline_mode<synchronous>, transform_indices = @transform_3, window_bounds = array<i64: 64, 64>}, {pipeline_mode = #tpu.pipeline_mode<synchronous>, transform_indices = @transform_4, window_bounds = array<i64: 8, 64>}, {pipeline_mode = #tpu.pipeline_mode<synchronous>, transform_indices = @transform_5, window_bounds = array<i64: 32, 64>}, {pipeline_mode = #tpu.pipeline_mode<synchronous>, transform_indices = @transform_6, window_bounds = array<i64: 184, 128>}, {pipeline_mode = #tpu.pipeline_mode<synchronous>, transform_indices = @transform_7, window_bounds = array<i64: 8, 8, 128>}]} {
    %c0 = arith.constant 0 : index
    %c0_0 = arith.constant 0 : index
    %0 = vector.load %arg7[%c0, %c0_0] : memref<184x128xf32, #tpu.memory_space<vmem>>, vector<32x128xf32>
    %c32 = arith.constant 32 : index
    %c0_1 = arith.constant 0 : index
    %1 = vector.load %arg7[%c32, %c0_1] : memref<184x128xf32, #tpu.memory_space<vmem>>, vector<32x128xf32>
    %c64 = arith.constant 64 : index
    %c0_2 = arith.constant 0 : index
    %2 = vector.load %arg7[%c64, %c0_2] : memref<184x128xf32, #tpu.memory_space<vmem>>, vector<8x128xf32>
    %c72 = arith.constant 72 : index
    %c0_3 = arith.constant 0 : index
    %3 = vector.load %arg7[%c72, %c0_3] : memref<184x128xf32, #tpu.memory_space<vmem>>, vector<96x128xf32>
    %c168 = arith.constant 168 : index
    %c0_4 = arith.constant 0 : index
    %4 = vector.load %arg7[%c168, %c0_4] : memref<184x128xf32, #tpu.memory_space<vmem>>, vector<16x128xf32>
    %5 = vector.extract_strided_slice %2 {offsets = [0, 0], sizes = [1, 128], strides = [1, 1]} : vector<8x128xf32> to vector<1x128xf32>
    %6 = vector.extract_strided_slice %2 {offsets = [1, 0], sizes = [1, 128], strides = [1, 1]} : vector<8x128xf32> to vector<1x128xf32>
    %c0_5 = arith.constant 0 : index
    %c0_6 = arith.constant 0 : index
    %7 = vector.load %arg1[%c0_5, %c0_6] : memref<64x32xf32, #tpu.memory_space<vmem>>, vector<64x32xf32>
    %cst = arith.constant dense<0.000000e+00> : vector<64x128xf32>
    %8 = tpu.matmul %7, %0, %cst {dimension_numbers = #tpu.dot_dimension_numbers<[1], [0], [0], [1], [0, 0, 1, 1], [], []>} : vector<64x32xf32>, vector<32x128xf32>, vector<64x128xf32> -> vector<64x128xf32>
    %9 = vector.broadcast %5 : vector<1x128xf32> to vector<64x128xf32>
    %10 = arith.addf %8, %9 : vector<64x128xf32>
    %c0_7 = arith.constant 0 : index
    %c0_8 = arith.constant 0 : index
    %11 = vector.load %arg3[%c0_7, %c0_8] : memref<8x16xf32, #tpu.memory_space<vmem>>, vector<8x16xf32>
    %cst_9 = arith.constant dense<0.000000e+00> : vector<8x128xf32>
    %12 = tpu.matmul %11, %4, %cst_9 {dimension_numbers = #tpu.dot_dimension_numbers<[1], [0], [0], [1], [0, 0, 1, 1], [], []>} : vector<8x16xf32>, vector<16x128xf32>, vector<8x128xf32> -> vector<8x128xf32>
    %13 = vector.broadcast %6 : vector<1x128xf32> to vector<8x128xf32>
    %14 = arith.addf %12, %13 : vector<8x128xf32>
    %15 = tpu.iota {dimensions = array<i32: 1>} : vector<8x128xi32>
    %c64_i32 = arith.constant 64 : i32
    %16 = vector.broadcast %c64_i32 : i32 to vector<8x128xi32>
    %17 = arith.cmpi sge, %15, %16 : vector<8x128xi32>
    %c96_i32 = arith.constant 96 : i32
    %18 = vector.broadcast %c96_i32 : i32 to vector<8x128xi32>
    %19 = arith.cmpi slt, %15, %18 : vector<8x128xi32>
    %20 = arith.andi %17, %19 : vector<8x128xi1>
    %c0_10 = arith.constant 0 : index
    %c0_11 = arith.constant 0 : index
    %c0_12 = arith.constant 0 : index
    %21 = vector.load %arg2[%c0_10, %c0_11, %c0_12] : memref<2x8x32xf32, #tpu.memory_space<vmem>>, vector<1x8x32xf32>
    %22 = vector.shape_cast %21 : vector<1x8x32xf32> to vector<8x32xf32>
    %c1 = arith.constant 1 : index
    %c0_13 = arith.constant 0 : index
    %c0_14 = arith.constant 0 : index
    %23 = vector.load %arg2[%c1, %c0_13, %c0_14] : memref<2x8x32xf32, #tpu.memory_space<vmem>>, vector<1x8x32xf32>
    %24 = vector.shape_cast %23 : vector<1x8x32xf32> to vector<8x32xf32>
    %25 = vector.extract_strided_slice %10 {offsets = [0, 0], sizes = [8, 128], strides = [1, 1]} : vector<64x128xf32> to vector<8x128xf32>
    %cst_15 = arith.constant dense<0.000000e+00> : vector<8x128xf32>
    %26 = tpu.matmul %22, %1, %cst_15 {dimension_numbers = #tpu.dot_dimension_numbers<[1], [0], [0], [1], [0, 0, 1, 1], [], []>} : vector<8x32xf32>, vector<32x128xf32>, vector<8x128xf32> -> vector<8x128xf32>
    %27 = arith.addf %25, %26 : vector<8x128xf32>
    %cst_16 = arith.constant 5.000000e-01 : f32
    %28 = vector.broadcast %cst_16 : f32 to vector<8x128xf32>
    %29 = arith.mulf %28, %27 : vector<8x128xf32>
    %30 = math.tanh %29 : vector<8x128xf32>
    %cst_17 = arith.constant 1.000000e+00 : f32
    %31 = vector.broadcast %cst_17 : f32 to vector<8x128xf32>
    %32 = arith.addf %30, %31 : vector<8x128xf32>
    %cst_18 = arith.constant 5.000000e-01 : f32
    %33 = vector.broadcast %cst_18 : f32 to vector<8x128xf32>
    %34 = arith.mulf %33, %32 : vector<8x128xf32>
    %35 = math.tanh %27 : vector<8x128xf32>
    %36 = arith.select %20, %35, %34 : vector<8x128xi1>, vector<8x128xf32>
    %37 = vector.extract_strided_slice %36 {offsets = [0, 0], sizes = [8, 32], strides = [1, 1]} : vector<8x128xf32> to vector<8x32xf32>
    %38 = vector.extract_strided_slice %36 {offsets = [0, 32], sizes = [8, 32], strides = [1, 1]} : vector<8x128xf32> to vector<8x32xf32>
    %39 = vector.extract_strided_slice %36 {offsets = [0, 64], sizes = [8, 32], strides = [1, 1]} : vector<8x128xf32> to vector<8x32xf32>
    %40 = vector.extract_strided_slice %36 {offsets = [0, 96], sizes = [8, 32], strides = [1, 1]} : vector<8x128xf32> to vector<8x32xf32>
    %41 = arith.mulf %38, %24 : vector<8x32xf32>
    %42 = arith.mulf %37, %39 : vector<8x32xf32>
    %43 = arith.addf %41, %42 : vector<8x32xf32>
    %44 = math.tanh %43 : vector<8x32xf32>
    %45 = arith.mulf %40, %44 : vector<8x32xf32>
    %46 = vector.extract_strided_slice %10 {offsets = [8, 0], sizes = [8, 128], strides = [1, 1]} : vector<64x128xf32> to vector<8x128xf32>
    %cst_19 = arith.constant dense<0.000000e+00> : vector<8x128xf32>
    %47 = tpu.matmul %45, %1, %cst_19 {dimension_numbers = #tpu.dot_dimension_numbers<[1], [0], [0], [1], [0, 0, 1, 1], [], []>} : vector<8x32xf32>, vector<32x128xf32>, vector<8x128xf32> -> vector<8x128xf32>
    %48 = arith.addf %46, %47 : vector<8x128xf32>
    %cst_20 = arith.constant 5.000000e-01 : f32
    %49 = vector.broadcast %cst_20 : f32 to vector<8x128xf32>
    %50 = arith.mulf %49, %48 : vector<8x128xf32>
    %51 = math.tanh %50 : vector<8x128xf32>
    %cst_21 = arith.constant 1.000000e+00 : f32
    %52 = vector.broadcast %cst_21 : f32 to vector<8x128xf32>
    %53 = arith.addf %51, %52 : vector<8x128xf32>
    %cst_22 = arith.constant 5.000000e-01 : f32
    %54 = vector.broadcast %cst_22 : f32 to vector<8x128xf32>
    %55 = arith.mulf %54, %53 : vector<8x128xf32>
    %56 = math.tanh %48 : vector<8x128xf32>
    %57 = arith.select %20, %56, %55 : vector<8x128xi1>, vector<8x128xf32>
    %58 = vector.extract_strided_slice %57 {offsets = [0, 0], sizes = [8, 32], strides = [1, 1]} : vector<8x128xf32> to vector<8x32xf32>
    %59 = vector.extract_strided_slice %57 {offsets = [0, 32], sizes = [8, 32], strides = [1, 1]} : vector<8x128xf32> to vector<8x32xf32>
    %60 = vector.extract_strided_slice %57 {offsets = [0, 64], sizes = [8, 32], strides = [1, 1]} : vector<8x128xf32> to vector<8x32xf32>
    %61 = vector.extract_strided_slice %57 {offsets = [0, 96], sizes = [8, 32], strides = [1, 1]} : vector<8x128xf32> to vector<8x32xf32>
    %62 = arith.mulf %59, %43 : vector<8x32xf32>
    %63 = arith.mulf %58, %60 : vector<8x32xf32>
    %64 = arith.addf %62, %63 : vector<8x32xf32>
    %65 = math.tanh %64 : vector<8x32xf32>
    %66 = arith.mulf %61, %65 : vector<8x32xf32>
    %67 = vector.extract_strided_slice %10 {offsets = [16, 0], sizes = [8, 128], strides = [1, 1]} : vector<64x128xf32> to vector<8x128xf32>
    %cst_23 = arith.constant dense<0.000000e+00> : vector<8x128xf32>
    %68 = tpu.matmul %66, %1, %cst_23 {dimension_numbers = #tpu.dot_dimension_numbers<[1], [0], [0], [1], [0, 0, 1, 1], [], []>} : vector<8x32xf32>, vector<32x128xf32>, vector<8x128xf32> -> vector<8x128xf32>
    %69 = arith.addf %67, %68 : vector<8x128xf32>
    %cst_24 = arith.constant 5.000000e-01 : f32
    %70 = vector.broadcast %cst_24 : f32 to vector<8x128xf32>
    %71 = arith.mulf %70, %69 : vector<8x128xf32>
    %72 = math.tanh %71 : vector<8x128xf32>
    %cst_25 = arith.constant 1.000000e+00 : f32
    %73 = vector.broadcast %cst_25 : f32 to vector<8x128xf32>
    %74 = arith.addf %72, %73 : vector<8x128xf32>
    %cst_26 = arith.constant 5.000000e-01 : f32
    %75 = vector.broadcast %cst_26 : f32 to vector<8x128xf32>
    %76 = arith.mulf %75, %74 : vector<8x128xf32>
    %77 = math.tanh %69 : vector<8x128xf32>
    %78 = arith.select %20, %77, %76 : vector<8x128xi1>, vector<8x128xf32>
    %79 = vector.extract_strided_slice %78 {offsets = [0, 0], sizes = [8, 32], strides = [1, 1]} : vector<8x128xf32> to vector<8x32xf32>
    %80 = vector.extract_strided_slice %78 {offsets = [0, 32], sizes = [8, 32], strides = [1, 1]} : vector<8x128xf32> to vector<8x32xf32>
    %81 = vector.extract_strided_slice %78 {offsets = [0, 64], sizes = [8, 32], strides = [1, 1]} : vector<8x128xf32> to vector<8x32xf32>
    %82 = vector.extract_strided_slice %78 {offsets = [0, 96], sizes = [8, 32], strides = [1, 1]} : vector<8x128xf32> to vector<8x32xf32>
    %83 = arith.mulf %80, %64 : vector<8x32xf32>
    %84 = arith.mulf %79, %81 : vector<8x32xf32>
    %85 = arith.addf %83, %84 : vector<8x32xf32>
    %86 = math.tanh %85 : vector<8x32xf32>
    %87 = arith.mulf %82, %86 : vector<8x32xf32>
    %88 = vector.extract_strided_slice %10 {offsets = [24, 0], sizes = [8, 128], strides = [1, 1]} : vector<64x128xf32> to vector<8x128xf32>
    %cst_27 = arith.constant dense<0.000000e+00> : vector<8x128xf32>
    %89 = tpu.matmul %87, %1, %cst_27 {dimension_numbers = #tpu.dot_dimension_numbers<[1], [0], [0], [1], [0, 0, 1, 1], [], []>} : vector<8x32xf32>, vector<32x128xf32>, vector<8x128xf32> -> vector<8x128xf32>
    %90 = arith.addf %88, %89 : vector<8x128xf32>
    %cst_28 = arith.constant 5.000000e-01 : f32
    %91 = vector.broadcast %cst_28 : f32 to vector<8x128xf32>
    %92 = arith.mulf %91, %90 : vector<8x128xf32>
    %93 = math.tanh %92 : vector<8x128xf32>
    %cst_29 = arith.constant 1.000000e+00 : f32
    %94 = vector.broadcast %cst_29 : f32 to vector<8x128xf32>
    %95 = arith.addf %93, %94 : vector<8x128xf32>
    %cst_30 = arith.constant 5.000000e-01 : f32
    %96 = vector.broadcast %cst_30 : f32 to vector<8x128xf32>
    %97 = arith.mulf %96, %95 : vector<8x128xf32>
    %98 = math.tanh %90 : vector<8x128xf32>
    %99 = arith.select %20, %98, %97 : vector<8x128xi1>, vector<8x128xf32>
    %100 = vector.extract_strided_slice %99 {offsets = [0, 0], sizes = [8, 32], strides = [1, 1]} : vector<8x128xf32> to vector<8x32xf32>
    %101 = vector.extract_strided_slice %99 {offsets = [0, 32], sizes = [8, 32], strides = [1, 1]} : vector<8x128xf32> to vector<8x32xf32>
    %102 = vector.extract_strided_slice %99 {offsets = [0, 64], sizes = [8, 32], strides = [1, 1]} : vector<8x128xf32> to vector<8x32xf32>
    %103 = vector.extract_strided_slice %99 {offsets = [0, 96], sizes = [8, 32], strides = [1, 1]} : vector<8x128xf32> to vector<8x32xf32>
    %104 = arith.mulf %101, %85 : vector<8x32xf32>
    %105 = arith.mulf %100, %102 : vector<8x32xf32>
    %106 = arith.addf %104, %105 : vector<8x32xf32>
    %107 = math.tanh %106 : vector<8x32xf32>
    %108 = arith.mulf %103, %107 : vector<8x32xf32>
    %109 = vector.extract_strided_slice %10 {offsets = [32, 0], sizes = [8, 128], strides = [1, 1]} : vector<64x128xf32> to vector<8x128xf32>
    %cst_31 = arith.constant dense<0.000000e+00> : vector<8x128xf32>
    %110 = tpu.matmul %108, %1, %cst_31 {dimension_numbers = #tpu.dot_dimension_numbers<[1], [0], [0], [1], [0, 0, 1, 1], [], []>} : vector<8x32xf32>, vector<32x128xf32>, vector<8x128xf32> -> vector<8x128xf32>
    %111 = arith.addf %109, %110 : vector<8x128xf32>
    %cst_32 = arith.constant 5.000000e-01 : f32
    %112 = vector.broadcast %cst_32 : f32 to vector<8x128xf32>
    %113 = arith.mulf %112, %111 : vector<8x128xf32>
    %114 = math.tanh %113 : vector<8x128xf32>
    %cst_33 = arith.constant 1.000000e+00 : f32
    %115 = vector.broadcast %cst_33 : f32 to vector<8x128xf32>
    %116 = arith.addf %114, %115 : vector<8x128xf32>
    %cst_34 = arith.constant 5.000000e-01 : f32
    %117 = vector.broadcast %cst_34 : f32 to vector<8x128xf32>
    %118 = arith.mulf %117, %116 : vector<8x128xf32>
    %119 = math.tanh %111 : vector<8x128xf32>
    %120 = arith.select %20, %119, %118 : vector<8x128xi1>, vector<8x128xf32>
    %121 = vector.extract_strided_slice %120 {offsets = [0, 0], sizes = [8, 32], strides = [1, 1]} : vector<8x128xf32> to vector<8x32xf32>
    %122 = vector.extract_strided_slice %120 {offsets = [0, 32], sizes = [8, 32], strides = [1, 1]} : vector<8x128xf32> to vector<8x32xf32>
    %123 = vector.extract_strided_slice %120 {offsets = [0, 64], sizes = [8, 32], strides = [1, 1]} : vector<8x128xf32> to vector<8x32xf32>
    %124 = vector.extract_strided_slice %120 {offsets = [0, 96], sizes = [8, 32], strides = [1, 1]} : vector<8x128xf32> to vector<8x32xf32>
    %125 = arith.mulf %122, %106 : vector<8x32xf32>
    %126 = arith.mulf %121, %123 : vector<8x32xf32>
    %127 = arith.addf %125, %126 : vector<8x32xf32>
    %128 = math.tanh %127 : vector<8x32xf32>
    %129 = arith.mulf %124, %128 : vector<8x32xf32>
    %130 = vector.extract_strided_slice %10 {offsets = [40, 0], sizes = [8, 128], strides = [1, 1]} : vector<64x128xf32> to vector<8x128xf32>
    %cst_35 = arith.constant dense<0.000000e+00> : vector<8x128xf32>
    %131 = tpu.matmul %129, %1, %cst_35 {dimension_numbers = #tpu.dot_dimension_numbers<[1], [0], [0], [1], [0, 0, 1, 1], [], []>} : vector<8x32xf32>, vector<32x128xf32>, vector<8x128xf32> -> vector<8x128xf32>
    %132 = arith.addf %130, %131 : vector<8x128xf32>
    %cst_36 = arith.constant 5.000000e-01 : f32
    %133 = vector.broadcast %cst_36 : f32 to vector<8x128xf32>
    %134 = arith.mulf %133, %132 : vector<8x128xf32>
    %135 = math.tanh %134 : vector<8x128xf32>
    %cst_37 = arith.constant 1.000000e+00 : f32
    %136 = vector.broadcast %cst_37 : f32 to vector<8x128xf32>
    %137 = arith.addf %135, %136 : vector<8x128xf32>
    %cst_38 = arith.constant 5.000000e-01 : f32
    %138 = vector.broadcast %cst_38 : f32 to vector<8x128xf32>
    %139 = arith.mulf %138, %137 : vector<8x128xf32>
    %140 = math.tanh %132 : vector<8x128xf32>
    %141 = arith.select %20, %140, %139 : vector<8x128xi1>, vector<8x128xf32>
    %142 = vector.extract_strided_slice %141 {offsets = [0, 0], sizes = [8, 32], strides = [1, 1]} : vector<8x128xf32> to vector<8x32xf32>
    %143 = vector.extract_strided_slice %141 {offsets = [0, 32], sizes = [8, 32], strides = [1, 1]} : vector<8x128xf32> to vector<8x32xf32>
    %144 = vector.extract_strided_slice %141 {offsets = [0, 64], sizes = [8, 32], strides = [1, 1]} : vector<8x128xf32> to vector<8x32xf32>
    %145 = vector.extract_strided_slice %141 {offsets = [0, 96], sizes = [8, 32], strides = [1, 1]} : vector<8x128xf32> to vector<8x32xf32>
    %146 = arith.mulf %143, %127 : vector<8x32xf32>
    %147 = arith.mulf %142, %144 : vector<8x32xf32>
    %148 = arith.addf %146, %147 : vector<8x32xf32>
    %149 = math.tanh %148 : vector<8x32xf32>
    %150 = arith.mulf %145, %149 : vector<8x32xf32>
    %151 = vector.extract_strided_slice %10 {offsets = [48, 0], sizes = [8, 128], strides = [1, 1]} : vector<64x128xf32> to vector<8x128xf32>
    %cst_39 = arith.constant dense<0.000000e+00> : vector<8x128xf32>
    %152 = tpu.matmul %150, %1, %cst_39 {dimension_numbers = #tpu.dot_dimension_numbers<[1], [0], [0], [1], [0, 0, 1, 1], [], []>} : vector<8x32xf32>, vector<32x128xf32>, vector<8x128xf32> -> vector<8x128xf32>
    %153 = arith.addf %151, %152 : vector<8x128xf32>
    %cst_40 = arith.constant 5.000000e-01 : f32
    %154 = vector.broadcast %cst_40 : f32 to vector<8x128xf32>
    %155 = arith.mulf %154, %153 : vector<8x128xf32>
    %156 = math.tanh %155 : vector<8x128xf32>
    %cst_41 = arith.constant 1.000000e+00 : f32
    %157 = vector.broadcast %cst_41 : f32 to vector<8x128xf32>
    %158 = arith.addf %156, %157 : vector<8x128xf32>
    %cst_42 = arith.constant 5.000000e-01 : f32
    %159 = vector.broadcast %cst_42 : f32 to vector<8x128xf32>
    %160 = arith.mulf %159, %158 : vector<8x128xf32>
    %161 = math.tanh %153 : vector<8x128xf32>
    %162 = arith.select %20, %161, %160 : vector<8x128xi1>, vector<8x128xf32>
    %163 = vector.extract_strided_slice %162 {offsets = [0, 0], sizes = [8, 32], strides = [1, 1]} : vector<8x128xf32> to vector<8x32xf32>
    %164 = vector.extract_strided_slice %162 {offsets = [0, 32], sizes = [8, 32], strides = [1, 1]} : vector<8x128xf32> to vector<8x32xf32>
    %165 = vector.extract_strided_slice %162 {offsets = [0, 64], sizes = [8, 32], strides = [1, 1]} : vector<8x128xf32> to vector<8x32xf32>
    %166 = vector.extract_strided_slice %162 {offsets = [0, 96], sizes = [8, 32], strides = [1, 1]} : vector<8x128xf32> to vector<8x32xf32>
    %167 = arith.mulf %164, %148 : vector<8x32xf32>
    %168 = arith.mulf %163, %165 : vector<8x32xf32>
    %169 = arith.addf %167, %168 : vector<8x32xf32>
    %170 = math.tanh %169 : vector<8x32xf32>
    %171 = arith.mulf %166, %170 : vector<8x32xf32>
    %172 = vector.extract_strided_slice %10 {offsets = [56, 0], sizes = [8, 128], strides = [1, 1]} : vector<64x128xf32> to vector<8x128xf32>
    %cst_43 = arith.constant dense<0.000000e+00> : vector<8x128xf32>
    %173 = tpu.matmul %171, %1, %cst_43 {dimension_numbers = #tpu.dot_dimension_numbers<[1], [0], [0], [1], [0, 0, 1, 1], [], []>} : vector<8x32xf32>, vector<32x128xf32>, vector<8x128xf32> -> vector<8x128xf32>
    %174 = arith.addf %172, %173 : vector<8x128xf32>
    %cst_44 = arith.constant 5.000000e-01 : f32
    %175 = vector.broadcast %cst_44 : f32 to vector<8x128xf32>
    %176 = arith.mulf %175, %174 : vector<8x128xf32>
    %177 = math.tanh %176 : vector<8x128xf32>
    %cst_45 = arith.constant 1.000000e+00 : f32
    %178 = vector.broadcast %cst_45 : f32 to vector<8x128xf32>
    %179 = arith.addf %177, %178 : vector<8x128xf32>
    %cst_46 = arith.constant 5.000000e-01 : f32
    %180 = vector.broadcast %cst_46 : f32 to vector<8x128xf32>
    %181 = arith.mulf %180, %179 : vector<8x128xf32>
    %182 = math.tanh %174 : vector<8x128xf32>
    %183 = arith.select %20, %182, %181 : vector<8x128xi1>, vector<8x128xf32>
    %184 = vector.extract_strided_slice %183 {offsets = [0, 0], sizes = [8, 32], strides = [1, 1]} : vector<8x128xf32> to vector<8x32xf32>
    %185 = vector.extract_strided_slice %183 {offsets = [0, 32], sizes = [8, 32], strides = [1, 1]} : vector<8x128xf32> to vector<8x32xf32>
    %186 = vector.extract_strided_slice %183 {offsets = [0, 64], sizes = [8, 32], strides = [1, 1]} : vector<8x128xf32> to vector<8x32xf32>
    %187 = vector.extract_strided_slice %183 {offsets = [0, 96], sizes = [8, 32], strides = [1, 1]} : vector<8x128xf32> to vector<8x32xf32>
    %188 = arith.mulf %185, %169 : vector<8x32xf32>
    %189 = arith.mulf %184, %186 : vector<8x32xf32>
    %190 = arith.addf %188, %189 : vector<8x32xf32>
    %191 = math.tanh %190 : vector<8x32xf32>
    %192 = arith.mulf %187, %191 : vector<8x32xf32>
    %193 = tpu.concatenate %45, %66, %87, %108, %129, %150, %171, %192 in 0 : vector<8x32xf32>, vector<8x32xf32>, vector<8x32xf32>, vector<8x32xf32>, vector<8x32xf32>, vector<8x32xf32>, vector<8x32xf32>, vector<8x32xf32> -> vector<64x32xf32>
    %c0_47 = arith.constant 0 : index
    %c0_48 = arith.constant 0 : index
    %194 = vector.load %arg4[%c0_47, %c0_48] : memref<64x64xf32, #tpu.memory_space<vmem>>, vector<64x64xf32>
    %c0_49 = arith.constant 0 : index
    %c0_50 = arith.constant 0 : index
    %195 = vector.load %arg6[%c0_49, %c0_50] : memref<32x64xf32, #tpu.memory_space<vmem>>, vector<32x64xf32>
    %cst_51 = arith.constant dense<0.000000e+00> : vector<64x64xf32>
    %196 = tpu.matmul %193, %195, %cst_51 {dimension_numbers = #tpu.dot_dimension_numbers<[1], [0], [0], [1], [0, 0, 1, 1], [], []>} : vector<64x32xf32>, vector<32x64xf32>, vector<64x64xf32> -> vector<64x64xf32>
    %cst_52 = arith.constant dense<0.000000e+00> : vector<64x64xf32>
    %197 = tpu.matmul %196, %194, %cst_52 {dimension_numbers = #tpu.dot_dimension_numbers<[1], [1], [0], [0], [0, 0, 1, 0], [], []>} : vector<64x64xf32>, vector<64x64xf32>, vector<64x64xf32> -> vector<64x64xf32>
    %198 = vector.shape_cast %197 : vector<64x64xf32> to vector<8x8x64xf32>
    %c0_53 = arith.constant 0 : index
    %c0_54 = arith.constant 0 : index
    %199 = vector.load %arg5[%c0_53, %c0_54] : memref<8x64xf32, #tpu.memory_space<vmem>>, vector<8x64xf32>
    %200 = vector.shape_cast %199 : vector<8x64xf32> to vector<1x8x64xf32>
    %201 = vector.broadcast %200 : vector<1x8x64xf32> to vector<8x8x64xf32>
    %202 = arith.addf %198, %201 : vector<8x8x64xf32>
    %cst_55 = arith.constant dense<0xFF800000> : vector<8x8xf32>
    %203 = vector.multi_reduction <maximumf>, %202, %cst_55 [2] : vector<8x8x64xf32> to vector<8x8xf32>
    %204 = vector.shape_cast %203 : vector<8x8xf32> to vector<8x8x1xf32>
    %205 = vector.broadcast %204 : vector<8x8x1xf32> to vector<8x8x64xf32>
    %206 = arith.subf %202, %205 : vector<8x8x64xf32>
    %207 = math.exp %206 : vector<8x8x64xf32>
    %cst_56 = arith.constant dense<0.000000e+00> : vector<8x8xf32>
    %208 = vector.multi_reduction <add>, %207, %cst_56 [2] : vector<8x8x64xf32> to vector<8x8xf32>
    %209 = vector.shape_cast %208 : vector<8x8xf32> to vector<8x8x1xf32>
    %210 = tpu.reciprocal %209 {approx = true} : vector<8x8x1xf32> -> vector<8x8x1xf32>
    %211 = vector.broadcast %210 : vector<8x8x1xf32> to vector<8x8x64xf32>
    %212 = arith.mulf %207, %211 : vector<8x8x64xf32>
    %213 = vector.shape_cast %212 : vector<8x8x64xf32> to vector<64x64xf32>
    %cst_57 = arith.constant dense<0.000000e+00> : vector<64x64xf32>
    %214 = tpu.matmul %213, %194, %cst_57 {dimension_numbers = #tpu.dot_dimension_numbers<[1], [0], [0], [1], [0, 0, 1, 1], [], []>} : vector<64x64xf32>, vector<64x64xf32>, vector<64x64xf32> -> vector<64x64xf32>
    %215 = tpu.concatenate %193, %214 in 1 : vector<64x32xf32>, vector<64x64xf32> -> vector<64x96xf32>
    %cst_58 = arith.constant dense<0.000000e+00> : vector<64x128xf32>
    %216 = tpu.matmul %215, %3, %cst_58 {dimension_numbers = #tpu.dot_dimension_numbers<[1], [0], [0], [1], [0, 0, 1, 1], [], []>} : vector<64x96xf32>, vector<96x128xf32>, vector<64x128xf32> -> vector<64x128xf32>
    %217 = vector.shape_cast %216 : vector<64x128xf32> to vector<8x8x128xf32>
    %218 = vector.shape_cast %14 : vector<8x128xf32> to vector<1x8x128xf32>
    %219 = vector.broadcast %218 : vector<1x8x128xf32> to vector<8x8x128xf32>
    %220 = arith.addf %217, %219 : vector<8x8x128xf32>
    %c0_59 = arith.constant 0 : index
    %c0_60 = arith.constant 0 : index
    %c0_61 = arith.constant 0 : index
    %221 = vector.load %arg8[%c0_59, %c0_60, %c0_61] : memref<8x8x128xf32, #tpu.memory_space<vmem>>, vector<8x8x128xf32>
    tpu.vector_store %arg8[%c0_59, %c0_60, %c0_61], %220 {strides = array<i32>} : memref<8x8x128xf32, #tpu.memory_space<vmem>>, vector<8x8x128xf32>,
    return
  }
  func.func @transform_0(%arg0: i32) -> (i32, i32) {
    %c0_i32 = arith.constant 0 : i32
    %c0_i32_0 = arith.constant 0 : i32
    %c0_i32_1 = arith.constant 0 : i32
    return %c0_i32, %c0_i32_0 : i32, i32
  }
  func.func @transform_1(%arg0: i32) -> (i32, i32, i32) {
    %c0_i32 = arith.constant 0 : i32
    %c0_i32_0 = arith.constant 0 : i32
    %c0_i32_1 = arith.constant 0 : i32
    %c0_i32_2 = arith.constant 0 : i32
    return %c0_i32, %c0_i32_0, %c0_i32_1 : i32, i32, i32
  }
  func.func @transform_2(%arg0: i32) -> (i32, i32) {
    %c0_i32 = arith.constant 0 : i32
    %c0_i32_0 = arith.constant 0 : i32
    %c0_i32_1 = arith.constant 0 : i32
    return %c0_i32, %c0_i32_0 : i32, i32
  }
  func.func @transform_3(%arg0: i32) -> (i32, i32) {
    %c0_i32 = arith.constant 0 : i32
    %c0_i32_0 = arith.constant 0 : i32
    %c0_i32_1 = arith.constant 0 : i32
    return %c0_i32, %c0_i32_0 : i32, i32
  }
  func.func @transform_4(%arg0: i32) -> (i32, i32) {
    %c0_i32 = arith.constant 0 : i32
    %c0_i32_0 = arith.constant 0 : i32
    %c0_i32_1 = arith.constant 0 : i32
    return %c0_i32, %c0_i32_0 : i32, i32
  }
  func.func @transform_5(%arg0: i32) -> (i32, i32) {
    %c0_i32 = arith.constant 0 : i32
    %c0_i32_0 = arith.constant 0 : i32
    %c0_i32_1 = arith.constant 0 : i32
    return %c0_i32, %c0_i32_0 : i32, i32
  }
  func.func @transform_6(%arg0: i32) -> (i32, i32) {
    %c0_i32 = arith.constant 0 : i32
    %c0_i32_0 = arith.constant 0 : i32
    %c0_i32_1 = arith.constant 0 : i32
    return %c0_i32, %c0_i32_0 : i32, i32
  }
  func.func @transform_7(%arg0: i32) -> (i32, i32, i32) {
    %c0_i32 = arith.constant 0 : i32
    %c0_i32_0 = arith.constant 0 : i32
    %c0_i32_1 = arith.constant 0 : i32
    %c0_i32_2 = arith.constant 0 : i32
    return %c0_i32, %c0_i32_0, %c0_i32_1 : i32, i32, i32
  }
}

</mosaic_0001>

<bundles_post_ra>
// kernel: tpu_custom_call.1
= control target key start
LH: loop header
LB: loop body
LE: loop exit
PB: predicated region body
PF: predicated region fallthrough
CT: control target
= control target key end

     0   :  { %12 = vsyncpa [#allocation3], 0  ;;  %s1763_s0 = inlined_call_operand.vmem [shape: f32[64,32], index: 0, kind: input, shape index: {}]   ;;  %s1764_s1 = inlined_call_operand.hbm [shape: f32[2,8,32], index: 1, kind: input, shape index: {}]   ;;  %s1765_s2 = inlined_call_operand.hbm [shape: f32[8,16], index: 2, kind: input, shape index: {}]   ;;  %s1766_s3 = inlined_call_operand.vmem [shape: f32[64,64], index: 3, kind: input, shape index: {}]   ;;  %s1767_s4 = inlined_call_operand.hbm [shape: f32[8,64], index: 4, kind: input, shape index: {}]   ;;  %s1768_s5 = inlined_call_operand.vmem [shape: f32[32,64], index: 5, kind: input, shape index: {}]   ;;  %s1769_s6 = inlined_call_operand.hbm [shape: f32[184,128], index: 6, kind: input, shape index: {}]   ;;  %s1770_s7 = inlined_call_operand.hbm [shape: f32[8,8,128], index: 7, kind: output, shape index: {}]  }
   0x1   :  { %13 = vsyncpa [#allocation6], 0 }
   0x2   :  { %14 = vsyncpa [#allocation9], 0  ;;  %s36_s26 = sshll.u32 %s1765_s2, 4  ;;  %s37_s26 = int_to_ptr.hbm [resolvable:$true] %s36_s26 }
   0x3   :  { %15 = vsyncpa [#allocation4], 0  ;;  %s1351_s27 = smov [#allocation5]   ;;  %s22_s8 = sshll.u32 %s1764_s1, 4  ;;  %s23_s8 = int_to_ptr.hbm [resolvable:$true] %s22_s8 }
   0x4   :  { %s38_s28 = sshll.u32 %s1351_s27, 4  ;;  %s1352_s9 = smov [#allocation2]   ;;  %s39_s28 = int_to_ptr.vmem [resolvable:$true] %s38_s28 }
   0x5   :  { %41 = dma.hbm_to_vmem [thread:$0]  %s37_s26, 128, %s39_s28, [#allocation6]  }
   0x6   :  { %s24_s10 = sshll.u32 %s1352_s9, 4  ;;  %s1353_s11 = smov 128   ;;  %s25_s10 = int_to_ptr.vmem [resolvable:$true] %s24_s10 }
   0x7   :  { %s1354_s12 = smov 8   ;;  %s49_s14 = sshll.u32 %s1767_s4, 4  ;;  %s50_s14 = int_to_ptr.hbm [resolvable:$true] %s49_s14 }
   0x8   :  { %30 = dma.hbm_to_vmem [thread:$0]  %s23_s8, 256, %s25_s10, [#allocation3], %s1353_s11, %s1353_s11, %s1354_s12  }
   0x9   :  { %s1355_s15 = smov [#allocation7]   ;;  %s61_s18 = sshll.u32 %s1769_s6, 4  ;;  %s62_s18 = int_to_ptr.hbm [resolvable:$true] %s61_s18 }
   0xa   :  { %s51_s16 = sshll.u32 %s1355_s15, 4  ;;  %s1356_s19 = smov [#allocation8]   ;;  %s52_s16 = int_to_ptr.vmem [resolvable:$true] %s51_s16 }
   0xb   :  { %54 = dma.hbm_to_vmem [thread:$0]  %s50_s14, 128, %s52_s16, [#allocation6]  }
   0xc   :  { %s63_s20 = sshll.u32 %s1356_s19, 4  ;;  %s64_s20 = int_to_ptr.vmem [resolvable:$true] %s63_s20 }
   0xd   :  { %69 = dma.hbm_to_vmem [thread:$0]  %s62_s18, 2944, %s64_s20, [#allocation9], %s1353_s11, %s1353_s11, %s1354_s12  }
   0xe   :  { %1343 = dma.done.wait [#allocation3], 256  }
   0xf   :  { %1344 = vsyncadd [#allocation3], 4294967040 }
  0x10   :  { %1345 = dma.done.wait [#allocation6], 256  }
  0x11   :  { %1346 = vsyncadd [#allocation6], 4294967040 }
  0x12   :  { %1347 = dma.done.wait [#allocation9], 2944  }
  0x13   :  { %1348 = vsyncadd [#allocation9], 4294964352  ;;  %v1418_v0 = vld [vmem:[#allocation8 + $0x38] sm:$0xff]  ;;  %v1420_v1 = vld [vmem:[#allocation8 + $0x30] sm:$0xff]  ;;  %vm118_vm0 = vcmask 261120   ;;  %v210_v16 = vlaneseq  ;;  %s1357_s21 = smov 64  }
  0x14   :  { %v89_v2 = vld [vmem:[#allocation8 + $0x18] sm:$0xff]  ;;  %233 = vmatpush.msra.mxu2 %v1418_v0  ;;  %v88_v3 = vld [vmem:[#allocation8 + $0x10] sm:$0xff]  ;;  %v1423_v4 = vld [vmem:[#allocation8 + $0x28] sm:$0xff]  ;;  %286 = vmatpush.msra.mxu3 %v1418_v0  ;;  %s1358_s22 = smov 32   ;;  %vm186_vm4 = vcmask 130048   ;;  %vm670_vm5 = vcmask 523264  }
  0x15   :  { %155 = vmatpush.msra.mxu0 %v89_v2  ;;  %v87_v5 = vld [vmem:[#allocation8 + $0x8] sm:$0xff]  ;;  %1130 = vmatpush.msra.mxu1 %v89_v2  ;;  %v1427_v6 = vld [vmem:[#allocation8 + $0x20] sm:$0xff]  ;;  %v211_v18 = vand.u32 127, %v210_v16  ;;  %v115_v53 = vld [vmem:[%s1763_s0 + $0x30] sm:$0xff]  ;;  %vm970_vm6 = vcmask 785408   ;;  %s1058_s15 = sshll.u32 %s1770_s7, 4  ;;  %s1059_s15 = int_to_ptr.hbm [resolvable:$true] %s1058_s15 }
  0x16   :  { %234 = vmatpush.msra.mxu2 %v1420_v1  ;;  %v86_v7 = vld [vmem:[#allocation8] sm:$0xff]  ;;  %287 = vmatpush.msra.mxu3 %v1420_v1  ;;  %v217_v25 = vld [vmem:[#allocation2 + $0x8] sm:$0xff]  ;;  %v108_v54 = vld [vmem:[#allocation8 + $0xb0] sm:$0xff] }
  0x17   :  { %156 = vmatpush.msra.mxu0 %v88_v3  ;;  %1131 = vmatpush.msra.mxu1 %v88_v3  ;;  %v215_v8 = vld [vmem:[#allocation2] sm:$0xff]  ;;  %vm212_vm1 = vcmp.ge.s32.totalorder %v211_v18, 64  ;;  %vm213_vm2 = vcmp.lt.s32.totalorder %v211_v18, 96  ;;  %v110_v35 = vld [vmem:[%s1763_s0 + $0x8] sm:$0xff]  ;;  %v111_v56 = vld [vmem:[%s1763_s0 + $0x10] sm:$0xff] }
  0x18   :  { %235 = vmatpush.msra.mxu2 %v1423_v4  ;;  %v109_v9 = vld [vmem:[%s1763_s0] sm:$0xff]  ;;  %288 = vmatpush.msra.mxu3 %v1423_v4  ;;  %vm1457_vm3 = vmand %vm212_vm1, %vm213_vm2  ;;  %v107_v55 = vld [vmem:[#allocation8 + $0xa8] sm:$0xff] }
  0x19   :  { %157 = vmatpush.msra.mxu0 %v87_v5  ;;  %1132 = vmatpush.msra.mxu1 %v87_v5  ;;  %v1451_v10 = vld [vmem:[#allocation8 + $0x40] sm:$0xff]  ;;  %v116_v57 = vld [vmem:[%s1763_s0 + $0x38] sm:$0xff]  ;;  %v184_v58 = vld [vmem:[#allocation5] sm:$0xff] }
  0x1a   :  { %236 = vmatpush.msra.mxu2 %v1427_v6  ;;  %289 = vmatpush.msra.mxu3 %v1427_v6  ;;  %v1454_v11 = vperm.slane %v1451_v10, 0 }
  0x1b   :  { %158 = vmatpush.msra.mxu0 %v86_v7  ;;  %1082 = vmatmul.msk.f32.vlgmr.msra.gmra.mxu2 %vm118_vm0, %v215_v8 }
  0x1c   :  { %1073 = vmatmul.msk.f32.vlgmr.msra.gmra.mxu0 %vm118_vm0, %v109_v9  ;;  %1133 = vmatpush.msra.mxu1 %v86_v7 }
  0x1d   :  { %384 = vmatpush.msrb.mxu2 %v1418_v0  ;;  %433 = vmatpush.msrb.mxu3 %v1418_v0 }
  0x1e   :  { %1079 = vmatmul.msk.f32.vlgmr.msra.gmra.mxu1 %vm118_vm0, %v115_v53 }
  0x1f   :  { %385 = vmatpush.msrb.mxu2 %v1420_v1  ;;  %434 = vmatpush.msrb.mxu3 %v1420_v1 }
  0x20   :  { %204 = vmatpush.msrb.mxu1 %v108_v54 }
  0x21   :  { %386 = vmatpush.msrb.mxu2 %v1423_v4  ;;  %435 = vmatpush.msrb.mxu3 %v1423_v4 }
  0x22   :  { %205 = vmatpush.msrb.mxu1 %v107_v55 }
  0x23   :  { %387 = vmatpush.msrb.mxu2 %v1427_v6  ;;  %436 = vmatpush.msrb.mxu3 %v1427_v6 }
  0x24   :  { %1074 = vmatmul.msk.f32.gmra.mxu0 %vm118_vm0, %v110_v35  ;;  %335 = vmatpush.msra.mxu1 %v1418_v0 }
  0x25   :  { %531 = vmatpush.msra.mxu2 %v1418_v0 }
  0x26   :  { %336 = vmatpush.msra.mxu1 %v1420_v1 }
  0x27   :  { %532 = vmatpush.msra.mxu2 %v1420_v1  ;;  %1080 = vmatmul.msk.f32.gmra.mxu1 %vm118_vm0, %v116_v57 }
  0x28   :  { %337 = vmatpush.msra.mxu1 %v1423_v4 }
  0x29   :  { %533 = vmatpush.msra.mxu2 %v1423_v4 }
  0x2a   :  { %338 = vmatpush.msra.mxu1 %v1427_v6 }
  0x2b   :  { %534 = vmatpush.msra.mxu2 %v1427_v6 }
  0x2c   :  { %1075 = vmatmul.msk.f32.gmra.mxu0 %vm118_vm0, %v111_v56 }
  0x2f   :  { %1081 = vmatmul.msk.f32.vlgmr.msrb.gmra.mxu1 %vm186_vm4, %v184_v58 }
  0x30   :  { %482 = vmatpush.msrb.mxu1 %v1418_v0 }
  0x32   :  { %483 = vmatpush.msrb.mxu1 %v1420_v1 }
  0x34   :  { %484 = vmatpush.msrb.mxu1 %v1423_v4 }
  0x36   :  { %485 = vmatpush.msrb.mxu1 %v1427_v6 }
  0x99   :  { %v160_v12 = vpop.f32.mrf.mxu0 }
  0x9a   :  { %v161_v13 = vadd.f32 %v160_v12, %v1454_v11 }
  0x9b   :  { %v1511_v62 = vpop.f32.mrf.mxu1 }
  0x9e   :  { %v238_v14 = vpop.f32.mrf.mxu2 }
  0x9f   :  { %v241_v15 = vadd.f32 %v238_v14, %v161_v13 }
  0xa1   :  { %v242_v17 = vmul.f32 0.5, %v241_v15  ;;  %v163_v37 = vpop.f32.mrf.mxu0 }
  0xa2   :  { %v164_v38 = vadd.f32 %v163_v37, %v1454_v11 }
  0xa3   :  { %1143 = vtanh.f32 %v242_v17 }
  0xa4   :  { %1145 = vtanh.f32 %v241_v15  ;;  %v1513_v63 = vpop.f32.mrf.mxu1 }
  0xa9   :  { %v1144_v19 = vpop.eup %1143 }
  0xaa   :  { %v244_v20 = vadd.f32 1.0, %v1144_v19  ;;  %v1146_v23 = vpop.eup %1145 }
  0xac   :  { %v245_v22 = vmul.f32 0.5, %v244_v20 }
  0xae   :  { %v247_v24 = vsel %vm1457_vm3, %v1146_v23, %v245_v22  ;;  %v112_v22 = vld [vmem:[%s1763_s0 + $0x18] sm:$0xff] }
  0xaf   :  { %254 = vrot.lane.b32.xlu0 %v247_v24, %s1357_s21  ;;  %1076 = vmatmul.msk.f32.gmra.mxu0 %vm118_vm0, %v112_v22 }
  0xb7   :  { %249 = vrot.lane.b32.xlu0 %v217_v25, %s1358_s22 }
 0x121   :  { %v255_v26 = vpop.permute.xlu0 %254 }
 0x122   :  { %v257_v27 = vmul.f32 %v255_v26, %v247_v24 }
 0x124   :  { %259 = vrot.lane.b32.xlu1 %v257_v27, %s1358_s22 }
 0x129   :  { %v250_v28 = vpop.permute.xlu0 %249 }
 0x12a   :  { %v252_v29 = vmul.f32 %v250_v28, %v247_v24 }
 0x196   :  { %v260_v30 = vpop.permute.xlu1 %259 }
 0x197   :  { %v262_v31 = vadd.f32 %v260_v30, %v252_v29 }
 0x199   :  { %1147 = vtanh.f32 %v262_v31 }
 0x19f   :  { %v1148_v32 = vpop.eup %1147 }
 0x1a0   :  { %265 = vrot.lane.b32.xlu1 %v1148_v32, %s1357_s21 }
 0x212   :  { %v266_v33 = vpop.permute.xlu1 %265 }
 0x213   :  { %v268_v34 = vmul.f32 %v266_v33, %v247_v24 }
 0x215   :  { %270 = vrot.lane.b32.xlu2 %v268_v34, %s1358_s22 }
 0x26f   :  { %v1472_v36 = vpop.permute.xlu2 %270 }
 0x270   :  { %1083 = vmatmul.msk.f32.vlgmr.msra.gmra.mxu3 %vm118_vm0, %v1472_v36 }
 0x271   :  { %580 = vmatpush.msra.mxu3 %v1418_v0  ;;  %v1515_v0 = vpop.f32.mrf.mxu1 }
 0x273   :  { %581 = vmatpush.msra.mxu3 %v1420_v1  ;;  %v166_v1 = vpop.f32.mrf.mxu0 }
 0x274   :  { %v167_v2 = vadd.f32 %v166_v1, %v1454_v11  ;;  %v114_v1 = vld [vmem:[%s1763_s0 + $0x28] sm:$0xff] }
 0x275   :  { %582 = vmatpush.msra.mxu3 %v1423_v4 }
 0x277   :  { %583 = vmatpush.msra.mxu3 %v1427_v6 }
 0x27b   :  { %v169_v24 = vpop.f32.mrf.mxu0 }
 0x27c   :  { %v170_v25 = vadd.f32 %v169_v24, %v1454_v11 }
 0x2f3   :  { %v291_v39 = vpop.f32.mrf.mxu3 }
 0x2f4   :  { %v294_v40 = vadd.f32 %v291_v39, %v164_v38 }
 0x2f6   :  { %v295_v41 = vmul.f32 0.5, %v294_v40 }
 0x2f8   :  { %1149 = vtanh.f32 %v295_v41 }
 0x2f9   :  { %1151 = vtanh.f32 %v294_v40 }
 0x2fe   :  { %v1150_v42 = vpop.eup %1149 }
 0x2ff   :  { %v297_v43 = vadd.f32 1.0, %v1150_v42  ;;  %v1152_v45 = vpop.eup %1151 }
 0x301   :  { %v298_v44 = vmul.f32 0.5, %v297_v43  ;;  %v113_v43 = vld [vmem:[%s1763_s0 + $0x20] sm:$0xff] }
 0x302   :  { %1077 = vmatmul.msk.f32.gmra.mxu0 %vm118_vm0, %v113_v43 }
 0x303   :  { %v300_v46 = vsel %vm1457_vm3, %v1152_v45, %v298_v44 }
 0x304   :  { %303 = vrot.lane.b32.xlu2 %v300_v46, %s1357_s21  ;;  %v301_v49 = vmul.f32 %v300_v46, %v262_v31 }
 0x30a   :  { %1078 = vmatmul.msk.f32.gmra.mxu0 %vm118_vm0, %v114_v1 }
 0x35e   :  { %v304_v47 = vpop.permute.xlu2 %303 }
 0x35f   :  { %v306_v48 = vmul.f32 %v304_v47, %v300_v46 }
 0x361   :  { %308 = vrot.lane.b32.xlu0 %v306_v48, %s1358_s22 }
 0x37f   :  { %v172_v45 = vpop.f32.mrf.mxu0 }
 0x3d3   :  { %v309_v50 = vpop.permute.xlu0 %308 }
 0x3d4   :  { %v311_v51 = vadd.f32 %v309_v50, %v301_v49 }
 0x3d6   :  { %1153 = vtanh.f32 %v311_v51 }
 0x3dc   :  { %v1154_v52 = vpop.eup %1153 }
 0x3dd   :  { %314 = vrot.lane.b32.xlu1 %v1154_v52, %s1357_s21 }
 0x44f   :  { %v315_v59 = vpop.permute.xlu1 %314 }
 0x450   :  { %v317_v60 = vmul.f32 %v315_v59, %v300_v46  ;;  %v173_v46 = vadd.f32 %v172_v45, %v1454_v11 }
 0x452   :  { %319 = vrot.lane.b32.xlu2 %v317_v60, %s1358_s22 }
 0x4ac   :  { %v1507_v61 = vpop.permute.xlu2 %319 }
 0x4ad   :  { %1084 = vmatmul.msk.f32.vlgmr.msra.gmra.mxu1 %vm118_vm0, %v1507_v61 }
 0x52a   :  { %v340_v3 = vpop.f32.mrf.mxu1 }
 0x52b   :  { %v343_v4 = vadd.f32 %v340_v3, %v167_v2 }
 0x52d   :  { %v344_v5 = vmul.f32 0.5, %v343_v4 }
 0x52f   :  { %1155 = vtanh.f32 %v344_v5  ;;  %v622_v5 = vld [vmem:[%s1768_s5 + $0x10] sm:$0xff] }
 0x530   :  { %1157 = vtanh.f32 %v343_v4  ;;  %v623_v4 = vld [vmem:[%s1768_s5 + $0x18] sm:$0xff] }
 0x531   :  { %641 = vmatpush.msra.mxu1 %v623_v4 }
 0x533   :  { %642 = vmatpush.msra.mxu1 %v622_v5 }
 0x535   :  { %v1156_v6 = vpop.eup %1155 }
 0x536   :  { %v346_v7 = vadd.f32 1.0, %v1156_v6  ;;  %v1158_v9 = vpop.eup %1157  ;;  %v621_v6 = vld [vmem:[%s1768_s5 + $0x8] sm:$0xff] }
 0x537   :  { %643 = vmatpush.msra.mxu1 %v621_v6  ;;  %v182_v6 = vadd.f32 %v1513_v63, %v1454_v11 }
 0x538   :  { %v347_v8 = vmul.f32 0.5, %v346_v7  ;;  %v620_v7 = vld [vmem:[%s1768_s5] sm:$0xff] }
 0x539   :  { %644 = vmatpush.msra.mxu1 %v620_v7 }
 0x53a   :  { %v349_v12 = vsel %vm1457_vm3, %v1158_v9, %v347_v8  ;;  %v175_v9 = vpop.f32.mrf.mxu0 }
 0x53b   :  { %352 = vrot.lane.b32.xlu0 %v349_v12, %s1357_s21  ;;  %v350_v15 = vmul.f32 %v349_v12, %v311_v51 }
 0x5ad   :  { %v353_v13 = vpop.permute.xlu0 %352 }
 0x5ae   :  { %v355_v14 = vmul.f32 %v353_v13, %v349_v12 }
 0x5b0   :  { %357 = vrot.lane.b32.xlu1 %v355_v14, %s1358_s22 }
 0x622   :  { %v358_v16 = vpop.permute.xlu1 %357 }
 0x623   :  { %v360_v17 = vadd.f32 %v358_v16, %v350_v15 }
 0x625   :  { %1159 = vtanh.f32 %v360_v17 }
 0x62b   :  { %v1160_v18 = vpop.eup %1159 }
 0x62c   :  { %363 = vrot.lane.b32.xlu2 %v1160_v18, %s1357_s21 }
 0x686   :  { %v364_v19 = vpop.permute.xlu2 %363 }
 0x687   :  { %v366_v20 = vmul.f32 %v364_v19, %v349_v12  ;;  %v176_v12 = vadd.f32 %v175_v9, %v1454_v11 }
 0x689   :  { %368 = vrot.lane.b32.xlu0 %v366_v20, %s1358_s22 }
 0x6fb   :  { %v1528_v23 = vpop.permute.xlu0 %368 }
 0x6fc   :  { %1085 = vmatmul.msk.f32.vlgmr.msrb.gmra.mxu2 %vm118_vm0, %v1528_v23 }
 0x77f   :  { %v389_v26 = vpop.f32.mrf.mxu2 }
 0x780   :  { %v392_v27 = vadd.f32 %v389_v26, %v170_v25 }
 0x782   :  { %v393_v28 = vmul.f32 0.5, %v392_v27 }
 0x784   :  { %1161 = vtanh.f32 %v393_v28 }
 0x785   :  { %1163 = vtanh.f32 %v392_v27 }
 0x78a   :  { %v1162_v29 = vpop.eup %1161 }
 0x78b   :  { %v395_v30 = vadd.f32 1.0, %v1162_v29  ;;  %v1164_v32 = vpop.eup %1163  ;;  %v619_v29 = vld [vmem:[%s1766_s3 + $0x38] sm:$0xff] }
 0x78c   :  { %1098 = vmatpush.xpose.msk.msrb.mxu2 %vm670_vm5, %v619_v29 }
 0x78d   :  { %v396_v31 = vmul.f32 0.5, %v395_v30  ;;  %v618_v30 = vld [vmem:[%s1766_s3 + $0x30] sm:$0xff] }
 0x78f   :  { %v398_v33 = vsel %vm1457_vm3, %v1164_v32, %v396_v31  ;;  %v617_v31 = vld [vmem:[%s1766_s3 + $0x28] sm:$0xff]  ;;  %v616_v32 = vld [vmem:[%s1766_s3 + $0x20] sm:$0xff] }
 0x790   :  { %401 = vrot.lane.b32.xlu1 %v398_v33, %s1357_s21  ;;  %v399_v37 = vmul.f32 %v398_v33, %v360_v17  ;;  %1099 = vmatpush.xpose.msk.msrb.mxu2 %vm670_vm5, %v618_v30 }
 0x794   :  { %1100 = vmatpush.xpose.msk.msrb.mxu2 %vm670_vm5, %v617_v31 }
 0x798   :  { %1101 = vmatpush.xpose.msk.msrb.mxu2 %vm670_vm5, %v616_v32 }
 0x802   :  { %v402_v34 = vpop.permute.xlu1 %401 }
 0x803   :  { %v404_v35 = vmul.f32 %v402_v34, %v398_v33  ;;  %v614_v34 = vld [vmem:[%s1766_s3 + $0x10] sm:$0xff] }
 0x805   :  { %406 = vrot.lane.b32.xlu2 %v404_v35, %s1358_s22 }
 0x85f   :  { %v407_v38 = vpop.permute.xlu2 %406 }
 0x860   :  { %v409_v39 = vadd.f32 %v407_v38, %v399_v37  ;;  %v613_v38 = vld [vmem:[%s1766_s3 + $0x8] sm:$0xff] }
 0x862   :  { %1165 = vtanh.f32 %v409_v39 }
 0x868   :  { %v1166_v40 = vpop.eup %1165 }
 0x869   :  { %412 = vrot.lane.b32.xlu0 %v1166_v40, %s1357_s21 }
 0x8db   :  { %v413_v41 = vpop.permute.xlu0 %412 }
 0x8dc   :  { %v415_v42 = vmul.f32 %v413_v41, %v398_v33  ;;  %v615_v33 = vld [vmem:[%s1766_s3 + $0x18] sm:$0xff] }
 0x8dd   :  { %1102 = vmatpush.xpose.msk.msrb.mxu2 %vm670_vm5, %v615_v33 }
 0x8de   :  { %417 = vrot.lane.b32.xlu1 %v415_v42, %s1358_s22 }
 0x8e1   :  { %1103 = vmatpush.xpose.msk.msrb.mxu2 %vm670_vm5, %v614_v34 }
 0x8e5   :  { %1104 = vmatpush.xpose.msk.msrb.mxu2 %vm670_vm5, %v613_v38 }
 0x950   :  { %v1543_v44 = vpop.permute.xlu1 %417 }
 0x951   :  { %1086 = vmatmul.msk.f32.vlgmr.msrb.gmra.mxu3 %vm118_vm0, %v1543_v44 }
 0x952   :  { %889 = vmatpush.msrb.mxu3 %v619_v29 }
 0x954   :  { %890 = vmatpush.msrb.mxu3 %v618_v30 }
 0x956   :  { %891 = vmatpush.msrb.mxu3 %v617_v31 }
 0x958   :  { %892 = vmatpush.msrb.mxu3 %v616_v32 }
 0x95a   :  { %893 = vmatpush.msrb.mxu3 %v615_v33 }
 0x95c   :  { %894 = vmatpush.msrb.mxu3 %v614_v34 }
 0x95e   :  { %895 = vmatpush.msrb.mxu3 %v613_v38 }
 0x9d4   :  { %v438_v47 = vpop.f32.mrf.mxu3 }
 0x9d5   :  { %v441_v48 = vadd.f32 %v438_v47, %v173_v46 }
 0x9d7   :  { %v442_v49 = vmul.f32 0.5, %v441_v48 }
 0x9d9   :  { %1167 = vtanh.f32 %v442_v49 }
 0x9da   :  { %1169 = vtanh.f32 %v441_v48  ;;  %v179_v48 = vadd.f32 %v1511_v62, %v1454_v11 }
 0x9df   :  { %v1168_v50 = vpop.eup %1167 }
 0x9e0   :  { %v444_v51 = vadd.f32 1.0, %v1168_v50  ;;  %v1170_v53 = vpop.eup %1169 }
 0x9e2   :  { %v445_v52 = vmul.f32 0.5, %v444_v51 }
 0x9e4   :  { %v447_v54 = vsel %vm1457_vm3, %v1170_v53, %v445_v52 }
 0x9e5   :  { %450 = vrot.lane.b32.xlu2 %v447_v54, %s1357_s21  ;;  %v448_v57 = vmul.f32 %v447_v54, %v409_v39  ;;  %v612_v39 = vld [vmem:[%s1766_s3] sm:$0xff]  ;;  %s1359_s3 = smov [#allocation10]  }
 0x9e6   :  { %896 = vmatpush.msrb.mxu3 %v612_v39  ;;  %1105 = vmatpush.xpose.msk.msrb.mxu2 %vm670_vm5, %v612_v39 }
 0xa3f   :  { %v451_v55 = vpop.permute.xlu2 %450 }
 0xa40   :  { %v453_v56 = vmul.f32 %v451_v55, %v447_v54 }
 0xa42   :  { %455 = vrot.lane.b32.xlu0 %v453_v56, %s1358_s22 }
 0xab4   :  { %v456_v58 = vpop.permute.xlu0 %455 }
 0xab5   :  { %v458_v59 = vadd.f32 %v456_v58, %v448_v57 }
 0xab7   :  { %1171 = vtanh.f32 %v458_v59 }
 0xabd   :  { %v1172_v60 = vpop.eup %1171 }
 0xabe   :  { %461 = vrot.lane.b32.xlu1 %v1172_v60, %s1357_s21 }
 0xb30   :  { %v462_v2 = vpop.permute.xlu1 %461 }
 0xb31   :  { %v464_v3 = vmul.f32 %v462_v2, %v447_v54 }
 0xb33   :  { %466 = vrot.lane.b32.xlu2 %v464_v3, %s1358_s22 }
 0xb8d   :  { %v1570_v8 = vpop.permute.xlu2 %466 }
 0xb8e   :  { %1087 = vmatmul.msk.f32.vlgmr.msrb.gmra.mxu1 %vm118_vm0, %v1570_v8 }
 0xb96   :  { %1090 = vmatmul.msk.f32.vlgmr.msra.gmra.mxu1 %vm118_vm0, %v1472_v36 }
 0xb9e   :  { %1091 = vmatmul.msk.f32.gmra.mxu1 %vm118_vm0, %v1507_v61 }
 0xba6   :  { %1092 = vmatmul.msk.f32.gmra.mxu1 %vm118_vm0, %v1528_v23 }
 0xbae   :  { %1093 = vmatmul.msk.f32.gmra.mxu1 %vm118_vm0, %v1543_v44 }
 0xbb6   :  { %1094 = vmatmul.msk.f32.gmra.mxu1 %vm118_vm0, %v1570_v8 }
 0xc0b   :  { %v487_v13 = vpop.f32.mrf.mxu1 }
 0xc0c   :  { %v490_v14 = vadd.f32 %v487_v13, %v176_v12 }
 0xc0e   :  { %v491_v15 = vmul.f32 0.5, %v490_v14 }
 0xc10   :  { %1173 = vtanh.f32 %v491_v15 }
 0xc11   :  { %1175 = vtanh.f32 %v490_v14 }
 0xc13   :  { %v646_v40 = vpop.f32.mrf.mxu1 }
 0xc16   :  { %v1174_v16 = vpop.eup %1173 }
 0xc17   :  { %v493_v17 = vadd.f32 1.0, %v1174_v16  ;;  %v1176_v19 = vpop.eup %1175 }
 0xc19   :  { %v494_v18 = vmul.f32 0.5, %v493_v17 }
 0xc1b   :  { %v496_v20 = vsel %vm1457_vm3, %v1176_v19, %v494_v18  ;;  %v649_v42 = vpop.f32.mrf.mxu1 }
 0xc1c   :  { %499 = vrot.lane.b32.xlu0 %v496_v20, %s1357_s21  ;;  %v497_v25 = vmul.f32 %v496_v20, %v458_v59 }
 0xc23   :  { %v652_v43 = vpop.f32.mrf.mxu1 }
 0xc2b   :  { %v655_v45 = vpop.f32.mrf.mxu1 }
 0xc33   :  { %v658_v46 = vpop.f32.mrf.mxu1 }
 0xc8e   :  { %v500_v22 = vpop.permute.xlu0 %499 }
 0xc8f   :  { %v502_v24 = vmul.f32 %v500_v22, %v496_v20 }
 0xc91   :  { %504 = vrot.lane.b32.xlu1 %v502_v24, %s1358_s22  ;;  %v1656_v24 = vld [vmem:[#allocation7] sm:$0xff] }
 0xd03   :  { %v505_v26 = vpop.permute.xlu1 %504 }
 0xd04   :  { %v507_v27 = vadd.f32 %v505_v26, %v497_v25 }
 0xd06   :  { %1177 = vtanh.f32 %v507_v27 }
 0xd0c   :  { %v1178_v28 = vpop.eup %1177 }
 0xd0d   :  { %510 = vrot.lane.b32.xlu2 %v1178_v28, %s1357_s21 }
 0xd67   :  { %v511_v35 = vpop.permute.xlu2 %510 }
 0xd68   :  { %v513_v37 = vmul.f32 %v511_v35, %v496_v20 }
 0xd6a   :  { %515 = vrot.lane.b32.xlu0 %v513_v37, %s1358_s22 }
 0xddc   :  { %v1623_v41 = vpop.permute.xlu0 %515 }
 0xddd   :  { %1088 = vmatmul.msk.f32.vlgmr.msra.gmra.mxu2 %vm118_vm0, %v1623_v41  ;;  %1095 = vmatmul.msk.f32.gmra.mxu1 %vm118_vm0, %v1623_v41 }
 0xde5   :  { %1106 = vmatmul.msk.f32.vlgmr.msrb.gmra.mxu2 %vm670_vm5, %v646_v40 }
 0xded   :  { %1107 = vmatmul.msk.f32.gmra.mxu2 %vm670_vm5, %v649_v42 }
 0xdf5   :  { %1108 = vmatmul.msk.f32.gmra.mxu2 %vm670_vm5, %v652_v43 }
 0xdfd   :  { %1109 = vmatmul.msk.f32.gmra.mxu2 %vm670_vm5, %v655_v45 }
 0xe05   :  { %1110 = vmatmul.msk.f32.gmra.mxu2 %vm670_vm5, %v658_v46 }
 0xe5a   :  { %v661_v47 = vpop.f32.mrf.mxu1 }
 0xe5b   :  { %1111 = vmatmul.msk.f32.gmra.mxu2 %vm670_vm5, %v661_v47 }
 0xe60   :  { %v536_v49 = vpop.f32.mrf.mxu2 }
 0xe61   :  { %v539_v50 = vadd.f32 %v536_v49, %v179_v48 }
 0xe63   :  { %v540_v51 = vmul.f32 0.5, %v539_v50 }
 0xe65   :  { %1179 = vtanh.f32 %v540_v51 }
 0xe66   :  { %1181 = vtanh.f32 %v539_v50 }
 0xe68   :  { %v736_v20 = vpop.f32.mrf.mxu2 }
 0xe69   :  { %v761_v25 = vadd.f32 %v1656_v24, %v736_v20 }
 0xe6b   :  { %v1180_v52 = vpop.eup %1179  ;;  %v769_v26 = vsel %vm670_vm5, %v761_v25, -inf }
 0xe6c   :  { %v542_v53 = vadd.f32 1.0, %v1180_v52  ;;  %v1182_v55 = vpop.eup %1181 }
 0xe6e   :  { %v543_v54 = vmul.f32 0.5, %v542_v53 }
 0xe70   :  { %v545_v56 = vsel %vm1457_vm3, %v1182_v55, %v543_v54  ;;  %v739_v11 = vpop.f32.mrf.mxu2 }
 0xe71   :  { %548 = vrot.lane.b32.xlu1 %v545_v56, %s1357_s21  ;;  %v546_v59 = vmul.f32 %v545_v56, %v507_v27  ;;  %v762_v37 = vadd.f32 %v1656_v24, %v739_v11 }
 0xe73   :  { %v772_v38 = vsel %vm670_vm5, %v762_v37, -inf }
 0xe78   :  { %v742_v63 = vpop.f32.mrf.mxu2 }
 0xe79   :  { %v763_v48 = vadd.f32 %v1656_v24, %v742_v63 }
 0xe7b   :  { %v775_v50 = vsel %vm670_vm5, %v763_v48, -inf }
 0xe80   :  { %v745_v22 = vpop.f32.mrf.mxu2 }
 0xe81   :  { %v1672_v51 = vadd.f32 %v1656_v24, %v745_v22 }
 0xe83   :  { %v778_v55 = vsel %vm670_vm5, %v1672_v51, -inf }
 0xe88   :  { %v748_v27 = vpop.f32.mrf.mxu2 }
 0xe89   :  { %v765_v21 = vadd.f32 %v1656_v24, %v748_v27 }
 0xe8b   :  { %v781_v28 = vsel %vm670_vm5, %v765_v21, -inf }
 0xede   :  { %v751_v39 = vpop.f32.mrf.mxu2 }
 0xedf   :  { %v766_v42 = vadd.f32 %v1656_v24, %v751_v39  ;;  %v97_v39 = vld [vmem:[#allocation8 + $0x58] sm:$0xff] }
 0xee1   :  { %v784_v45 = vsel %vm670_vm5, %v766_v42, -inf }
 0xee3   :  { %v549_v57 = vpop.permute.xlu1 %548 }
 0xee4   :  { %v551_v58 = vmul.f32 %v549_v57, %v545_v56 }
 0xee6   :  { %553 = vrot.lane.b32.xlu2 %v551_v58, %s1358_s22 }
 0xf40   :  { %v554_v62 = vpop.permute.xlu2 %553 }
 0xf41   :  { %v556_v60 = vadd.f32 %v554_v62, %v546_v59 }
 0xf43   :  { %1183 = vtanh.f32 %v556_v60 }
 0xf49   :  { %v1184_v1 = vpop.eup %1183 }
 0xf4a   :  { %559 = vrot.lane.b32.xlu0 %v1184_v1, %s1357_s21 }
 0xfbc   :  { %v560_v2 = vpop.permute.xlu0 %559 }
 0xfbd   :  { %v562_v3 = vmul.f32 %v560_v2, %v545_v56 }
 0xfbf   :  { %564 = vrot.lane.b32.xlu1 %v562_v3, %s1358_s22 }
0x1031   :  { %v1643_v4 = vpop.permute.xlu1 %564 }
0x1032   :  { %1089 = vmatmul.msk.f32.vlgmr.msra.gmra.mxu3 %vm118_vm0, %v1643_v4  ;;  %1096 = vmatmul.msk.f32.gmra.mxu1 %vm118_vm0, %v1643_v4 }
0x10af   :  { %v664_v5 = vpop.f32.mrf.mxu1 }
0x10b0   :  { %1112 = vmatmul.msk.f32.gmra.mxu2 %vm670_vm5, %v664_v5 }
0x10b5   :  { %v585_v7 = vpop.f32.mrf.mxu3 }
0x10b6   :  { %v588_v9 = vadd.f32 %v585_v7, %v182_v6 }
0x10b8   :  { %v589_v12 = vmul.f32 0.5, %v588_v9 }
0x10ba   :  { %1185 = vtanh.f32 %v589_v12 }
0x10bb   :  { %1187 = vtanh.f32 %v588_v9 }
0x10c0   :  { %v1186_v13 = vpop.eup %1185 }
0x10c1   :  { %v591_v14 = vadd.f32 1.0, %v1186_v13  ;;  %v1188_v16 = vpop.eup %1187 }
0x10c3   :  { %v592_v15 = vmul.f32 0.5, %v591_v14 }
0x10c5   :  { %v594_v17 = vsel %vm1457_vm3, %v1188_v16, %v592_v15 }
0x10c6   :  { %597 = vrot.lane.b32.xlu2 %v594_v17, %s1357_s21  ;;  %v595_v29 = vmul.f32 %v594_v17, %v556_v60 }
0x1120   :  { %v598_v18 = vpop.permute.xlu2 %597 }
0x1121   :  { %v600_v19 = vmul.f32 %v598_v18, %v594_v17 }
0x1123   :  { %602 = vrot.lane.b32.xlu0 %v600_v19, %s1358_s22 }
0x1133   :  { %v754_v56 = vpop.f32.mrf.mxu2 }
0x1134   :  { %v1677_v59 = vadd.f32 %v1656_v24, %v754_v56 }
0x1136   :  { %v787_v1 = vsel %vm670_vm5, %v1677_v59, -inf }
0x114d   :  { %770 = vmax.xlane.f32.xlu0 %v769_v26 }
0x1155   :  { %782 = vmax.xlane.f32.xlu0 %v781_v28 }
0x1195   :  { %v603_v30 = vpop.permute.xlu0 %602 }
0x1196   :  { %v605_v31 = vadd.f32 %v603_v30, %v595_v29  ;;  %v106_v29 = vld [vmem:[#allocation8 + $0xa0] sm:$0xff]  ;;  %v105_v30 = vld [vmem:[#allocation8 + $0x98] sm:$0xff] }
0x1197   :  { %999 = vmatpush.msrb.mxu0 %v106_v29 }
0x1198   :  { %1189 = vtanh.f32 %v605_v31  ;;  %v104_v31 = vld [vmem:[#allocation8 + $0x90] sm:$0xff] }
0x1199   :  { %1000 = vmatpush.msrb.mxu0 %v105_v30 }
0x119b   :  { %1001 = vmatpush.msrb.mxu0 %v104_v31 }
0x119e   :  { %v1190_v32 = vpop.eup %1189 }
0x119f   :  { %608 = vrot.lane.b32.xlu1 %v1190_v32, %s1357_s21  ;;  %v103_v32 = vld [vmem:[#allocation8 + $0x88] sm:$0xff]  ;;  %s1056_s21 = sshll.u32 %s1359_s3, 4  ;;  %s1057_s21 = int_to_ptr.vmem [resolvable:$true] %s1056_s21 }
0x11a0   :  { %1002 = vmatpush.msrb.mxu0 %v103_v32 }
0x11c0   :  { %v771_v33 = vpop.xlane.xlu0 %770 }
0x11c1   :  { %v793_v34 = vsub.f32 %v761_v25, %v771_v33  ;;  %v102_v33 = vld [vmem:[#allocation8 + $0x80] sm:$0xff] }
0x11c2   :  { %1003 = vmatpush.msrb.mxu0 %v102_v33 }
0x11c3   :  { %v801_v35 = vmul.f32 1.442695, %v793_v34  ;;  %v101_v34 = vld [vmem:[#allocation8 + $0x78] sm:$0xff] }
0x11c4   :  { %1004 = vmatpush.msrb.mxu0 %v101_v34 }
0x11c5   :  { %1191 = vpow2.f32 %v801_v35  ;;  %v100_v35 = vld [vmem:[#allocation8 + $0x70] sm:$0xff] }
0x11c6   :  { %1005 = vmatpush.msrb.mxu0 %v100_v35 }
0x11c8   :  { %v783_v49 = vpop.xlane.xlu0 %782 }
0x11c9   :  { %773 = vmax.xlane.f32.xlu1 %v772_v38  ;;  %v797_v60 = vsub.f32 %v765_v21, %v783_v49  ;;  %v98_v38 = vld [vmem:[#allocation8 + $0x60] sm:$0xff] }
0x11cb   :  { %v1192_v40 = vpop.eup %1191  ;;  %v809_v2 = vmul.f32 1.442695, %v797_v60 }
0x11cc   :  { %v817_v43 = vsel %vm670_vm5, %v1192_v40, 0.0 }
0x11cd   :  { %818 = vadd.xlane.f32.xlu0 %v817_v43 }
0x11d1   :  { %785 = vmax.xlane.f32.xlu1 %v784_v45 }
0x1211   :  { %v609_v46 = vpop.permute.xlu1 %608 }
0x1212   :  { %v611_v47 = vmul.f32 %v609_v46, %v594_v17 }
0x1214   :  { %625 = vrot.lane.b32.xlu2 %v611_v47, %s1358_s22 }
0x123c   :  { %v774_v52 = vpop.xlane.xlu1 %773 }
0x123d   :  { %776 = vmax.xlane.f32.xlu2 %v775_v50  ;;  %v794_v54 = vsub.f32 %v762_v37, %v774_v52  ;;  %v99_v37 = vld [vmem:[#allocation8 + $0x68] sm:$0xff] }
0x123e   :  { %1006 = vmatpush.msrb.mxu0 %v99_v37 }
0x123f   :  { %v803_v57 = vmul.f32 1.442695, %v794_v54 }
0x1240   :  { %v819_v53 = vpop.xlane.xlu0 %818  ;;  %1007 = vmatpush.msrb.mxu0 %v98_v38 }
0x1241   :  { %1193 = vrcp.f32 %v819_v53 }
0x1242   :  { %1195 = vpow2.f32 %v803_v57  ;;  %1008 = vmatpush.msrb.mxu0 %v97_v39 }
0x1243   :  { %1197 = vpow2.f32 %v809_v2 }
0x1244   :  { %v786_v12 = vpop.xlane.xlu1 %785 }
0x1245   :  { %779 = vmax.xlane.f32.xlu2 %v778_v55  ;;  %v798_v15 = vsub.f32 %v766_v42, %v786_v12  ;;  %v95_v42 = vld [vmem:[#allocation8 + $0x48] sm:$0xff] }
0x1247   :  { %v1194_v58 = vpop.eup %1193  ;;  %v811_v17 = vmul.f32 1.442695, %v798_v15 }
0x1248   :  { %v849_v62 = vmul.f32 %v1194_v58, %v1192_v40  ;;  %v1196_v3 = vpop.eup %1195  ;;  %v96_v40 = vld [vmem:[#allocation8 + $0x50] sm:$0xff] }
0x1249   :  { %v820_v5 = vsel %vm670_vm5, %v1196_v3, 0.0  ;;  %v1683_v6 = vpop.eup %1197  ;;  %1009 = vmatpush.msrb.mxu0 %v96_v40 }
0x124a   :  { %1114 = vmatmul.msk.f32.vlgmr.msrb.gmra.mxu3 %vm670_vm5, %v849_v62  ;;  %v829_v7 = vsel %vm670_vm5, %v1683_v6, 0.0 }
0x124b   :  { %1010 = vmatpush.msrb.mxu0 %v95_v42 }
0x124d   :  { %788 = vmax.xlane.f32.xlu2 %v787_v1 }
0x1255   :  { %821 = vadd.xlane.f32.xlu2 %v820_v5 }
0x125d   :  { %830 = vadd.xlane.f32.xlu2 %v829_v7 }
0x126e   :  { %v1687_v9 = vpop.permute.xlu2 %625 }
0x126f   :  { %1097 = vmatmul.msk.f32.gmra.mxu1 %vm118_vm0, %v1687_v9 }
0x12b0   :  { %v777_v13 = vpop.xlane.xlu2 %776 }
0x12b1   :  { %v795_v14 = vsub.f32 %v763_v48, %v777_v13 }
0x12b3   :  { %v805_v16 = vmul.f32 1.442695, %v795_v14 }
0x12b5   :  { %1199 = vpow2.f32 %v805_v16 }
0x12b6   :  { %1201 = vpow2.f32 %v811_v17 }
0x12b8   :  { %v780_v18 = vpop.xlane.xlu2 %779 }
0x12b9   :  { %v796_v50 = vsub.f32 %v1672_v51, %v780_v18 }
0x12bb   :  { %v1200_v19 = vpop.eup %1199  ;;  %v807_v52 = vmul.f32 1.442695, %v796_v50 }
0x12bc   :  { %v823_v20 = vsel %vm670_vm5, %v1200_v19, 0.0  ;;  %v1692_v63 = vpop.eup %1201 }
0x12bd   :  { %824 = vadd.xlane.f32.xlu0 %v823_v20  ;;  %v832_v22 = vsel %vm670_vm5, %v1692_v63, 0.0 }
0x12c0   :  { %v789_v11 = vpop.xlane.xlu2 %788 }
0x12c1   :  { %v799_v55 = vsub.f32 %v1677_v59, %v789_v11 }
0x12c3   :  { %v813_v57 = vmul.f32 1.442695, %v799_v55 }
0x12c5   :  { %833 = vadd.xlane.f32.xlu0 %v832_v22 }
0x12c8   :  { %v822_v25 = vpop.xlane.xlu2 %821 }
0x12c9   :  { %1203 = vrcp.f32 %v822_v25 }
0x12cd   :  { %v898_v21 = vpop.f32.mrf.mxu3 }
0x12cf   :  { %v1204_v26 = vpop.eup %1203 }
0x12d0   :  { %v850_v27 = vmul.f32 %v1204_v26, %v1196_v3  ;;  %v831_v14 = vpop.xlane.xlu2 %830 }
0x12d2   :  { %1115 = vmatmul.msk.f32.gmra.mxu3 %vm670_vm5, %v850_v27 }
0x12d9   :  { %938 = vrot.lane.b32.xlu0 %v898_v21, %s1358_s22 }
0x12ec   :  { %v667_v28 = vpop.f32.mrf.mxu1 }
0x12ed   :  { %1113 = vmatmul.msk.f32.gmra.mxu2 %vm670_vm5, %v667_v28 }
0x1330   :  { %v825_v43 = vpop.xlane.xlu0 %824 }
0x1331   :  { %1205 = vrcp.f32 %v825_v43 }
0x1332   :  { %1207 = vpow2.f32 %v807_v52 }
0x1333   :  { %1209 = vpow2.f32 %v813_v57 }
0x1337   :  { %v1206_v45 = vpop.eup %1205 }
0x1338   :  { %v851_v46 = vmul.f32 %v1206_v45, %v1200_v19  ;;  %v834_v47 = vpop.xlane.xlu0 %833  ;;  %v1208_v58 = vpop.eup %1207 }
0x1339   :  { %v826_v62 = vsel %vm670_vm5, %v1208_v58, 0.0 }
0x133a   :  { %1116 = vmatmul.msk.f32.gmra.mxu3 %vm670_vm5, %v851_v46 }
0x134b   :  { %v939_v48 = vpop.permute.xlu0 %938 }
0x134c   :  { %v962_v49 = vsel %vm118_vm0, %v1472_v36, %v939_v48  ;;  %v1210_v36 = vpop.eup %1209 }
0x134d   :  { %1122 = vmatmul.msk.f32.vlgmr.msrb.gmra.mxu0 %vm970_vm6, %v962_v49  ;;  %v835_v60 = vsel %vm670_vm5, %v1210_v36, 0.0 }
0x1355   :  { %v901_v51 = vpop.f32.mrf.mxu3 }
0x1370   :  { %v757_v53 = vpop.f32.mrf.mxu2 }
0x1371   :  { %v768_v54 = vadd.f32 %v1656_v24, %v757_v53  ;;  %v185_v24 = vperm.slane %v1451_v10, 1 }
0x1373   :  { %v790_v56 = vsel %vm670_vm5, %v768_v54, -inf  ;;  %v1712_v59 = vadd.f32 %v1515_v0, %v185_v24 }
0x1374   :  { %791 = vmax.xlane.f32.xlu1 %v790_v56 }
0x137c   :  { %827 = vadd.xlane.f32.xlu1 %v826_v62 }
0x1384   :  { %836 = vadd.xlane.f32.xlu1 %v835_v60 }
0x139d   :  { %940 = vrot.lane.b32.xlu1 %v901_v51, %s1358_s22 }
0x13bd   :  { %v904_v11 = vpop.f32.mrf.mxu3 }
0x13ca   :  { %v1012_v1 = vpop.f32.mrf.mxu0 }
0x13cb   :  { %v1036_v2 = vadd.f32 %v1012_v1, %v1712_v59 }
0x13cd   :  { %1044 = vst [vmem:[#allocation10] sm:$0xff] %v1036_v2 }
0x13e7   :  { %v792_v3 = vpop.xlane.xlu1 %791 }
0x13e8   :  { %v800_v5 = vsub.f32 %v768_v54, %v792_v3 }
0x13ea   :  { %v815_v7 = vmul.f32 1.442695, %v800_v5 }
0x13ec   :  { %1211 = vpow2.f32 %v815_v7 }
0x13ef   :  { %v828_v12 = vpop.xlane.xlu1 %827 }
0x13f0   :  { %1213 = vrcp.f32 %v828_v12 }
0x13f1   :  { %1215 = vrcp.f32 %v831_v14 }
0x13f2   :  { %v1212_v13 = vpop.eup %1211  ;;  %1217 = vrcp.f32 %v834_v47 }
0x13f3   :  { %v838_v15 = vsel %vm670_vm5, %v1212_v13, 0.0 }
0x13f4   :  { %839 = vadd.xlane.f32.xlu2 %v838_v15 }
0x13f6   :  { %v1214_v16 = vpop.eup %1213 }
0x13f7   :  { %v852_v10 = vmul.f32 %v1214_v16, %v1208_v58  ;;  %v1216_v0 = vpop.eup %1215  ;;  %v837_v18 = vpop.xlane.xlu1 %836 }
0x13f8   :  { %v853_v17 = vmul.f32 %v1216_v0, %v1683_v6  ;;  %v1218_v19 = vpop.eup %1217  ;;  %1219 = vrcp.f32 %v837_v18 }
0x13f9   :  { %1117 = vmatmul.msk.f32.gmra.mxu3 %vm670_vm5, %v852_v10  ;;  %v854_v20 = vmul.f32 %v1218_v19, %v1692_v63 }
0x13fe   :  { %v1220_v22 = vpop.eup %1219 }
0x13ff   :  { %v855_v26 = vmul.f32 %v1220_v22, %v1210_v36 }
0x1401   :  { %1118 = vmatmul.msk.f32.gmra.mxu3 %vm670_vm5, %v853_v17 }
0x1409   :  { %1119 = vmatmul.msk.f32.gmra.mxu3 %vm670_vm5, %v854_v20 }
0x140c   :  { %942 = vrot.lane.b32.xlu2 %v904_v11, %s1358_s22 }
0x140f   :  { %v941_v25 = vpop.permute.xlu1 %940 }
0x1410   :  { %v963_v27 = vsel %vm118_vm0, %v1507_v61, %v941_v25 }
0x1411   :  { %1120 = vmatmul.msk.f32.gmra.mxu3 %vm670_vm5, %v855_v26  ;;  %1123 = vmatmul.msk.f32.gmra.mxu0 %vm970_vm6, %v963_v27 }
0x1467   :  { %v840_v6 = vpop.xlane.xlu2 %839 }
0x1468   :  { %1221 = vrcp.f32 %v840_v6 }
0x146e   :  { %v1222_v21 = vpop.eup %1221 }
0x146f   :  { %v943_v28 = vpop.permute.xlu2 %942  ;;  %v856_v63 = vmul.f32 %v1222_v21, %v1212_v13 }
0x1470   :  { %v964_v29 = vsel %vm118_vm0, %v1528_v23, %v943_v28 }
0x1471   :  { %1121 = vmatmul.msk.f32.gmra.mxu3 %vm670_vm5, %v856_v63  ;;  %1124 = vmatmul.msk.f32.gmra.mxu0 %vm970_vm6, %v964_v29 }
0x147c   :  { %v907_v30 = vpop.f32.mrf.mxu3 }
0x147d   :  { %944 = vrot.lane.b32.xlu0 %v907_v30, %s1358_s22 }
0x1484   :  { %v910_v61 = vpop.f32.mrf.mxu3 }
0x1485   :  { %946 = vrot.lane.b32.xlu1 %v910_v61, %s1358_s22 }
0x148c   :  { %v913_v31 = vpop.f32.mrf.mxu3 }
0x148d   :  { %948 = vrot.lane.b32.xlu0 %v913_v31, %s1358_s22 }
0x148e   :  { %v1015_v32 = vpop.f32.mrf.mxu0 }
0x148f   :  { %v1037_v33 = vadd.f32 %v1015_v32, %v1712_v59 }
0x1491   :  { %1045 = vst [vmem:[#allocation10 + $0x8] sm:$0xff] %v1037_v33 }
0x1494   :  { %v916_v34 = vpop.f32.mrf.mxu3 }
0x1495   :  { %950 = vrot.lane.b32.xlu2 %v916_v34, %s1358_s22 }
0x14ee   :  { %v1018_v23 = vpop.f32.mrf.mxu0 }
0x14ef   :  { %v1038_v35 = vadd.f32 %v1018_v23, %v1712_v59  ;;  %v945_v37 = vpop.permute.xlu0 %944  ;;  %v951_v46 = vpop.permute.xlu2 %950 }
0x14f0   :  { %v965_v38 = vsel %vm118_vm0, %v1543_v44, %v945_v37  ;;  %v968_v44 = vsel %vm118_vm0, %v1643_v4, %v951_v46 }
0x14f1   :  { %1046 = vst [vmem:[#allocation10 + $0x10] sm:$0xff] %v1038_v35  ;;  %1125 = vmatmul.msk.f32.gmra.mxu0 %vm970_vm6, %v965_v38 }
0x14f4   :  { %v919_v39 = vpop.f32.mrf.mxu3 }
0x14f5   :  { %952 = vrot.lane.b32.xlu1 %v919_v39, %s1358_s22 }
0x14f7   :  { %v947_v40 = vpop.permute.xlu1 %946 }
0x14f8   :  { %v966_v42 = vsel %vm118_vm0, %v1570_v8, %v947_v40 }
0x14f9   :  { %1126 = vmatmul.msk.f32.gmra.mxu0 %vm970_vm6, %v966_v42 }
0x14ff   :  { %v949_v43 = vpop.permute.xlu0 %948 }
0x1500   :  { %v967_v45 = vsel %vm118_vm0, %v1623_v41, %v949_v43 }
0x1501   :  { %1127 = vmatmul.msk.f32.gmra.mxu0 %vm970_vm6, %v967_v45 }
0x1509   :  { %1128 = vmatmul.msk.f32.gmra.mxu0 %vm970_vm6, %v968_v44 }
0x1567   :  { %v953_v47 = vpop.permute.xlu1 %952 }
0x1568   :  { %v969_v48 = vsel %vm118_vm0, %v1687_v9, %v953_v47 }
0x1569   :  { %1129 = vmatmul.msk.f32.gmra.mxu0 %vm970_vm6, %v969_v48 }
0x156e   :  { %v1021_v8 = vpop.f32.mrf.mxu0 }
0x156f   :  { %v1039_v49 = vadd.f32 %v1021_v8, %v1712_v59 }
0x1571   :  { %1047 = vst [vmem:[#allocation10 + $0x18] sm:$0xff] %v1039_v49 }
0x1576   :  { %v1024_v50 = vpop.f32.mrf.mxu0 }
0x1577   :  { %v1040_v41 = vadd.f32 %v1024_v50, %v1712_v59 }
0x1579   :  { %1048 = vst [vmem:[#allocation10 + $0x20] sm:$0xff] %v1040_v41 }
0x157e   :  { %v1027_v52 = vpop.f32.mrf.mxu0 }
0x157f   :  { %v1041_v53 = vadd.f32 %v1027_v52, %v1712_v59 }
0x1581   :  { %1049 = vst [vmem:[#allocation10 + $0x28] sm:$0xff] %v1041_v53 }
0x1586   :  { %v1030_v4 = vpop.f32.mrf.mxu0 }
0x1587   :  { %v1042_v54 = vadd.f32 %v1030_v4, %v1712_v59 }
0x1589   :  { %1050 = vst [vmem:[#allocation10 + $0x30] sm:$0xff] %v1042_v54 }
0x15e6   :  { %v1033_v9 = vpop.f32.mrf.mxu0 }
0x15e7   :  { %v1043_v55 = vadd.f32 %v1033_v9, %v1712_v59 }
0x15e9   :  { %1051 = vst [vmem:[#allocation10 + $0x38] sm:$0xff] %v1043_v55 }
0x15ea   :  { %1064 = dma.vmem_to_hbm [thread:$0]  %s1057_s21, 1024, %s1059_s15, [#allocation4], %s1353_s11, %s1353_s11, %s1354_s12  }
0x15eb   :  { %1349 = dma.done.wait [#allocation4], 1024  }
0x15ec   :  { %1350 = vsyncadd [#allocation4], 4294966272 }
0x15ed   :  { %1069 = vsyncpa [#allocation3], 1 }
0x15ee   :  { %1070 = vsyncpa [#allocation6], 1 }
0x15ef   :  { %1071 = vsyncpa [#allocation9], 1 }
0x15f0   :  { %1072 = vsyncpa [#allocation4], 1 }

</bundles_post_ra>
